<compile_context>
chip_gen: v7x
topology: tpu7x:2x2x1
jax: 0.10.0
libtpu: 0.0.40
codegen_flags: <defaults>
</compile_context>

<pallas_src>
import functools

import numpy as np
import jax
import jax.numpy as jnp
from jax import lax
from jax.experimental import pallas as pl
from jax.experimental.pallas import tpu as pltpu


# ----------------------------------------------------------------------------- helpers

def _layer_norm(x, g, b, eps):
    u = jnp.mean(x, axis=-1, keepdims=True)
    c = x - u
    s = jnp.mean(c * c, axis=-1, keepdims=True)
    return c * lax.rsqrt(s + eps) * g + b


def _mish(x):
    # gelu() in the reference module is actually nn.Mish: x * tanh(softplus(x)).
    sp = jnp.maximum(x, 0.0) + jnp.log(1.0 + jnp.exp(-jnp.abs(x)))
    return x * jnp.tanh(sp)


def _rep_spec(arr):
    """Full-array block, constant index map (weight stays VMEM resident)."""
    shape = arr.shape
    return pl.BlockSpec(shape, lambda *_: (0,) * len(shape))


def _row_tiling(n, cap=256):
    """Row tile (multiple of 8, <= cap) plus padded row count (multiple of the tile).

    The tile is halved when the whole batch would otherwise be one grid step so the
    'parallel' grid axis can split across the two v7x TensorCores.
    """
    n8 = ((n + 7) // 8) * 8
    tr = min(cap, n8)
    if tr == n8 and n8 >= 16:
        tr = ((n8 // 2 + 7) // 8) * 8
    n_pad = ((n8 + tr - 1) // tr) * tr
    return tr, n_pad


# ------------------------------------------------------- kernel 1: attention + FFN block

def _attn_ffn_kernel(x_ref, mask_ref,
                     wqkv_ref, bqkv_ref, wo_ref, bo_ref, g1_ref, be1_ref,
                     w1_ref, b1_ref, w2_ref, b2_ref, g2_ref, be2_ref,
                     out_ref, *, num_heads, max_v_len, eps):
    f32 = jnp.float32
    bf16 = jnp.bfloat16

    x = x_ref[0]                                   # (L, D) f32
    seq_len, d = x.shape
    dh = d // num_heads
    scale = 1.0 / float(np.sqrt(dh))

    # Fused QKV projection: one bf16 MXU matmul, f32 accumulation.
    qkv = jnp.dot(x.astype(bf16), wqkv_ref[...],
                  preferred_element_type=f32) + bqkv_ref[...]
    qb = qkv[:, :d].astype(bf16)
    kb = qkv[:, d:2 * d].astype(bf16)
    vb = qkv[:, 2 * d:].astype(bf16)

    # make_pad_shifted_mask as a single select built from iota + the (1, L) valid mask.
    msk = mask_ref[0]                              # (1, L) f32
    qi = lax.broadcasted_iota(jnp.int32, (seq_len, seq_len), 0)
    ki = lax.broadcasted_iota(jnp.int32, (seq_len, seq_len), 1)
    shifted = (ki < max_v_len) | ((qi >= max_v_len) & (ki <= qi))
    add_mask = jnp.where(shifted & (msk > 0.0), 0.0, -10000.0)   # (L, L) f32

    # Head-batched attention (single batched contraction per step, no lane concat).
    q_h = jnp.stack([qb[:, h * dh:(h + 1) * dh] for h in range(num_heads)], axis=0)
    k_h = jnp.stack([kb[:, h * dh:(h + 1) * dh] for h in range(num_heads)], axis=0)
    v_h = jnp.stack([vb[:, h * dh:(h + 1) * dh] for h in range(num_heads)], axis=0)

    sc = jnp.einsum("hqd,hkd->hqk", q_h, k_h,
                    preferred_element_type=f32) * scale + add_mask[None]
    sc = sc - jnp.max(sc, axis=-1, keepdims=True)
    e = jnp.exp(sc)
    p = e * pl.reciprocal(jnp.sum(e, axis=-1, keepdims=True), approx=True)
    ctx = jnp.einsum("hqk,hkd->hqd", p.astype(bf16), v_h,
                     preferred_element_type=f32)                 # (H, L, dh) f32

    # BertSelfOutput dense as a per-head accumulated projection (lane-dense output).
    att = bo_ref[...]                              # (1, D) broadcasts on first add
    for h in range(num_heads):
        att = att + jnp.dot(ctx[h].astype(bf16), wo_ref[h],
                            preferred_element_type=f32)
    y1 = _layer_norm(att + x, g1_ref[...], be1_ref[...], eps)

    # BertIntermediate (Mish) + BertOutput: dense + residual + LayerNorm.
    h1 = _mish(jnp.dot(y1.astype(bf16), w1_ref[...],
                       preferred_element_type=f32) + b1_ref[...])
    y2 = jnp.dot(h1.astype(bf16), w2_ref[...],
                 preferred_element_type=f32) + b2_ref[...]
    out_ref[0] = _layer_norm(y2 + y1, g2_ref[...], be2_ref[...], eps)


def _attention_ffn_block(hidden_states, attention_mask, p, cfg):
    b, l, d = hidden_states.shape
    nh = cfg["num_heads"]
    dh = d // nh
    bf16 = jnp.bfloat16
    mask3 = attention_mask.reshape(b, 1, l).astype(jnp.float32)
    weights = (p["att_wqkv"].astype(bf16), p["att_bqkv"],
               p["att_wo"].astype(bf16).reshape(nh, dh, d), p["att_bo"],
               p["att_ln_g"], p["att_ln_b"],
               p["ffn_w1"].astype(bf16), p["ffn_b1"],
               p["ffn_w2"].astype(bf16), p["ffn_b2"],
               p["ffn_ln_g"], p["ffn_ln_b"])
    kernel = functools.partial(_attn_ffn_kernel, num_heads=nh,
                               max_v_len=cfg["max_v_len"], eps=cfg["eps"])
    return pl.pallas_call(
        kernel,
        out_shape=jax.ShapeDtypeStruct((b, l, d), jnp.float32),
        grid=(b,),
        in_specs=[pl.BlockSpec((1, l, d), lambda i: (i, 0, 0)),
                  pl.BlockSpec((1, 1, l), lambda i: (i, 0, 0))]
                 + [_rep_spec(w) for w in weights],
        out_specs=pl.BlockSpec((1, l, d), lambda i: (i, 0, 0)),
        compiler_params=pltpu.CompilerParams(dimension_semantics=("parallel",)),
    )(hidden_states.astype(jnp.float32), mask3, *weights)


# -------------------------------------- kernel 2: Fuser block (HAM / M2RF [+ mem-output])

def _fuser_kernel(*args, num_heads, n_src, eps, fuse_output):
    f32 = jnp.float32
    bf16 = jnp.bfloat16

    src_refs = args[:n_src]
    (wqkv_ref, bqkv_ref, wo_ref, bo_ref, wso_ref, bso_ref, g1_ref, be1_ref,
     w1_ref, b1_ref, w2_ref, b2_ref, g2_ref, be2_ref) = args[n_src:n_src + 14]
    if fuse_output:
        mo_w_ref, mo_b_ref, mo_g_ref, mo_be_ref = args[n_src + 14:n_src + 18]
    out_ref = args[-1]

    srcs = [r[...] for r in src_refs]              # each (TR, D) f32
    tr, d = srcs[0].shape
    dh = d // num_heads
    scale = 1.0 / float(np.sqrt(dh))

    # nn.MultiheadAttention in_proj per sequence position (S positions, S tiny).
    wqkv = wqkv_ref[...]
    bqkv = bqkv_ref[...]
    qs, ks, vs = [], [], []
    for s in srcs:
        pqkv = jnp.dot(s.astype(bf16), wqkv, preferred_element_type=f32) + bqkv
        qs.append(pqkv[:, :d])
        ks.append(pqkv[:, d:2 * d])
        vs.append(pqkv[:, 2 * d:])

    # Block-diagonal head-pooling matrices: pool (D, H) sums each head's dh lanes,
    # expand (H, D) broadcasts a per-head scalar back across its dh lanes.
    di = lax.broadcasted_iota(jnp.int32, (d, num_heads), 0)
    hi = lax.broadcasted_iota(jnp.int32, (d, num_heads), 1)
    pool = ((di >= hi * dh) & (di < (hi + 1) * dh)).astype(f32)
    di2 = lax.broadcasted_iota(jnp.int32, (num_heads, d), 1)
    hi2 = lax.broadcasted_iota(jnp.int32, (num_heads, d), 0)
    expand = ((di2 >= hi2 * dh) & (di2 < (hi2 + 1) * dh)).astype(f32)

    # Attention over the tiny S axis: VPU products + pooling matmuls, no per-head
    # micro-matmuls; everything stays as lane-dense (TR, D) / (TR, H) slabs.
    ctxs = []
    for si in range(n_src):
        raw = [jnp.dot(qs[si] * ks[ti], pool, preferred_element_type=f32) * scale
               for ti in range(n_src)]             # each (TR, H) per-head scores
        mx = raw[0]
        for r in raw[1:]:
            mx = jnp.maximum(mx, r)
        es = [jnp.exp(r - mx) for r in raw]
        den = es[0]
        for ev in es[1:]:
            den = den + ev
        inv = pl.reciprocal(den, approx=True)
        ctx = jnp.zeros((tr, d), f32)
        for ti in range(n_src):
            prob_full = jnp.dot(es[ti] * inv, expand, preferred_element_type=f32)
            ctx = ctx + prob_full * vs[ti]
        ctxs.append(ctx)

    wo = wo_ref[...]
    wso = wso_ref[...]
    w1 = w1_ref[...]
    w2 = w2_ref[...]
    acc = jnp.zeros((tr, d), f32)
    for si in range(n_src):
        # out_proj, then Fuser.self_output / intermediate (Mish) / output.
        a = jnp.dot(ctxs[si].astype(bf16), wo, preferred_element_type=f32) + bo_ref[...]
        y1 = _layer_norm(jnp.dot(a.astype(bf16), wso, preferred_element_type=f32)
                         + bso_ref[...] + srcs[si], g1_ref[...], be1_ref[...], eps)
        hm = _mish(jnp.dot(y1.astype(bf16), w1, preferred_element_type=f32) + b1_ref[...])
        y2 = jnp.dot(hm.astype(bf16), w2, preferred_element_type=f32) + b2_ref[...]
        acc = acc + _layer_norm(y2 + y1, g2_ref[...], be2_ref[...], eps)

    fused = acc * (1.0 / n_src)                    # mean over S (soft HAM / M2RF)

    if fuse_output:
        # memory_output BertSelfOutput fused here: residual is hidden_states = srcs[0].
        mo = jnp.dot(fused.astype(bf16), mo_w_ref[...],
                     preferred_element_type=f32) + mo_b_ref[...]
        out_ref[...] = _layer_norm(mo + srcs[0], mo_g_ref[...], mo_be_ref[...], eps)
    else:
        out_ref[...] = fused


def _fuser_block(src_rows, fp, cfg, mo=None):
    nb, d = src_rows[0].shape
    tr, n_pad = _row_tiling(nb, cap=256)
    srcs = [s.astype(jnp.float32) for s in src_rows]
    if n_pad != nb:
        srcs = [jnp.pad(s, ((0, n_pad - nb), (0, 0))) for s in srcs]
    n_src = len(srcs)

    bf16 = jnp.bfloat16
    weights = [fp["wqkv"].astype(bf16), fp["bqkv"], fp["wo"].astype(bf16), fp["bo"],
               fp["wso"].astype(bf16), fp["bso"], fp["ln1_g"], fp["ln1_b"],
               fp["w1"].astype(bf16), fp["b1"], fp["w2"].astype(bf16), fp["b2"],
               fp["ln2_g"], fp["ln2_b"]]
    if mo is not None:
        mo_w, mo_b, mo_g, mo_be = mo
        weights += [mo_w.astype(bf16), mo_b, mo_g, mo_be]

    kernel = functools.partial(_fuser_kernel, num_heads=cfg["num_heads"],
                               n_src=n_src, eps=cfg["eps"], fuse_output=(mo is not None))
    out = pl.pallas_call(
        kernel,
        out_shape=jax.ShapeDtypeStruct((n_pad, d), jnp.float32),
        grid=(n_pad // tr,),
        in_specs=[pl.BlockSpec((tr, d), lambda i: (i, 0)) for _ in range(n_src)]
                 + [_rep_spec(w) for w in weights],
        out_specs=pl.BlockSpec((tr, d), lambda i: (i, 0)),
        compiler_params=pltpu.CompilerParams(dimension_semantics=("parallel",)),
    )(*srcs, *weights)
    return out[:nb]


# ----------------------------------------------------------------- full forward (wrapper)

def bert_layer_with_memory(prev_m, hidden_states, attention_mask, params, cfg, epoch=0):
    """Mirrors BertLayerWithMemory.forward(prev_m, hidden_states, attention_mask, epoch)."""
    del epoch  # dropout probability is 0 at epoch 0 / inference
    b, l, d = hidden_states.shape
    if attention_mask is None:
        attention_mask = jnp.ones((b, l), jnp.float32)

    # attention + intermediate + output -> updated hidden_states
    hs = _attention_ffn_block(hidden_states, attention_mask, params, cfg)
    hs_rows = hs.reshape(b * l, d)

    # HAM (self.memory): soft mode, all-ones agent masks -> mean over memory slots of
    # Fuser(prev_m).  Empty memory (prev_m None / 0 slots) returns zeros.
    if prev_m is None or prev_m.shape[2] == 0:
        memory_fused_rows = jnp.zeros_like(hs_rows)
        prev_m = jnp.zeros((b, l, 0, d), hs.dtype)
    else:
        m = prev_m.shape[2]
        slot_rows = [prev_m[:, :, j, :].reshape(b * l, d) for j in range(m)]
        memory_fused_rows = _fuser_block(slot_rows, params["ham"], cfg)

    updated_m = jnp.concatenate([prev_m, hs[:, :, None, :]], axis=2)

    # M2RF (self.memory_fuser) + memory_output (BertSelfOutput) fused into one kernel:
    # sources are (hs, memory_fused) passed as separate row-tiled inputs (no stack
    # materialized); the memory_output residual is hs (source 0).
    layer_out_rows = _fuser_block(
        [hs_rows, memory_fused_rows], params["m2rf"], cfg,
        mo=(params["mo_w"], params["mo_b"], params["mo_ln_g"], params["mo_ln_b"]))
    layer_out = layer_out_rows.reshape(b, l, d)
    return updated_m, layer_out


# ------------------------------------------------------------------------ parameter init

def _dense(key, d_in, d_out):
    kw, kb = jax.random.split(key)
    w_t = jax.random.normal(kw, (d_in, d_out), jnp.float32) / np.sqrt(d_in)
    bias = 0.02 * jax.random.normal(kb, (1, d_out), jnp.float32)
    return w_t, bias


def _ln_init(key, d):
    kg, kb = jax.random.split(key)
    g = 1.0 + 0.1 * jax.random.normal(kg, (1, d), jnp.float32)
    b = 0.05 * jax.random.normal(kb, (1, d), jnp.float32)
    return g, b


def _init_fuser_params(key, d, inter):
    ks = jax.random.split(key, 7)
    wqkv, bqkv = _dense(ks[0], d, 3 * d)
    wo, bo = _dense(ks[1], d, d)
    wso, bso = _dense(ks[2], d, d)
    ln1_g, ln1_b = _ln_init(ks[3], d)
    w1, b1 = _dense(ks[4], d, inter)
    w2, b2 = _dense(ks[5], inter, d)
    ln2_g, ln2_b = _ln_init(ks[6], d)
    return dict(wqkv=wqkv, bqkv=bqkv, wo=wo, bo=bo, wso=wso, bso=bso,
                ln1_g=ln1_g, ln1_b=ln1_b, w1=w1, b1=b1, w2=w2, b2=b2,
                ln2_g=ln2_g, ln2_b=ln2_b)


def init_params(key, d, inter):
    ks = jax.random.split(key, 10)
    att_wqkv, att_bqkv = _dense(ks[0], d, 3 * d)
    att_wo, att_bo = _dense(ks[1], d, d)
    att_ln_g, att_ln_b = _ln_init(ks[2], d)
    ffn_w1, ffn_b1 = _dense(ks[3], d, inter)
    ffn_w2, ffn_b2 = _dense(ks[4], inter, d)
    ffn_ln_g, ffn_ln_b = _ln_init(ks[5], d)
    mo_w, mo_b = _dense(ks[6], d, d)
    mo_ln_g, mo_ln_b = _ln_init(ks[7], d)
    return dict(
        att_wqkv=att_wqkv, att_bqkv=att_bqkv, att_wo=att_wo, att_bo=att_bo,
        att_ln_g=att_ln_g, att_ln_b=att_ln_b,
        ffn_w1=ffn_w1, ffn_b1=ffn_b1, ffn_w2=ffn_w2, ffn_b2=ffn_b2,
        ffn_ln_g=ffn_ln_g, ffn_ln_b=ffn_ln_b,
        mo_w=mo_w, mo_b=mo_b, mo_ln_g=mo_ln_g, mo_ln_b=mo_ln_b,
        ham=_init_fuser_params(ks[8], d, inter),
        m2rf=_init_fuser_params(ks[9], d, inter),
    )


# ------------------------------------------------------------------- pure-JAX reference

def _reference_forward(prev_m, hidden_states, attention_mask, p, cfg):
    hp = lax.Precision.HIGHEST
    d = cfg["hidden_size"]
    nheads = cfg["num_heads"]
    v_len = cfg["max_v_len"]
    t_len = cfg["max_t_len"]
    eps = cfg["eps"]
    bsz, seq, _ = hidden_states.shape
    dh = d // nheads

    def ln(x, g, b):
        u = x.mean(-1, keepdims=True)
        s = ((x - u) ** 2).mean(-1, keepdims=True)
        return (x - u) / jnp.sqrt(s + eps) * g + b

    def mish(x):
        return x * jnp.tanh(jax.nn.softplus(x))

    def mha(x, wqkv, bqkv, wo, bo, add_mask=None):
        n, s, _ = x.shape
        qkv = jnp.einsum("nsd,de->nse", x, wqkv, precision=hp) + bqkv
        q = qkv[..., :d].reshape(n, s, nheads, dh)
        k = qkv[..., d:2 * d].reshape(n, s, nheads, dh)
        vv = qkv[..., 2 * d:].reshape(n, s, nheads, dh)
        sc = jnp.einsum("nshd,nthd->nhst", q, k, precision=hp) / np.sqrt(dh)
        if add_mask is not None:
            sc = sc + add_mask[:, None, :, :]
        pr = jax.nn.softmax(sc, axis=-1)
        ctx = jnp.einsum("nhst,nthd->nshd", pr, vv, precision=hp).reshape(n, s, d)
        return jnp.einsum("nsd,de->nse", ctx, wo, precision=hp) + bo

    # make_pad_shifted_mask (memory_len = 0), torch-style construction
    shifted = jnp.zeros((seq, seq), jnp.float32).at[:, :v_len].set(1.0)
    shifted = shifted.at[v_len:, v_len:].set(jnp.tril(jnp.ones((t_len, t_len), jnp.float32)))
    pad_shifted = shifted[None] * attention_mask[:, None, :]
    add_mask = (1.0 - pad_shifted) * (-10000.0)

    att = mha(hidden_states, p["att_wqkv"], p["att_bqkv"], p["att_wo"], p["att_bo"], add_mask)
    att_out = ln(att + hidden_states, p["att_ln_g"], p["att_ln_b"])
    inter = mish(jnp.einsum("nld,di->nli", att_out, p["ffn_w1"], precision=hp) + p["ffn_b1"])
    hs = ln(jnp.einsum("nli,id->nld", inter, p["ffn_w2"], precision=hp) + p["ffn_b2"] + att_out,
            p["ffn_ln_g"], p["ffn_ln_b"])

    def fuser(x, fp):
        a = mha(x, fp["wqkv"], fp["bqkv"], fp["wo"], fp["bo"])
        y1 = ln(jnp.einsum("nsd,de->nse", a, fp["wso"], precision=hp) + fp["bso"] + x,
                fp["ln1_g"], fp["ln1_b"])
        h2 = mish(jnp.einsum("nsd,di->nsi", y1, fp["w1"], precision=hp) + fp["b1"])
        return ln(jnp.einsum("nsi,id->nsd", h2, fp["w2"], precision=hp) + fp["b2"] + y1,
                  fp["ln2_g"], fp["ln2_b"])

    if prev_m is None or prev_m.shape[2] == 0:
        memory_fused = jnp.zeros_like(hs)
        prev_m = jnp.zeros((bsz, seq, 0, d), hs.dtype)
    else:
        m = prev_m.shape[2]
        memory_fused = jnp.mean(fuser(prev_m.reshape(bsz * seq, m, d), p["ham"]),
                                axis=1).reshape(bsz, seq, d)

    updated_m = jnp.concatenate([prev_m, hs[:, :, None, :]], axis=2)

    stacked = jnp.stack([hs, memory_fused], axis=2).reshape(bsz * seq, 2, d)
    fused = jnp.mean(fuser(stacked, p["m2rf"]), axis=1).reshape(bsz, seq, d)

    mo = jnp.einsum("nld,de->nle", fused, p["mo_w"], precision=hp) + p["mo_b"]
    layer_out = ln(mo + hs, p["mo_ln_g"], p["mo_ln_b"])
    return updated_m, layer_out


# ----------------------------------------------------------------------------------- main

if __name__ == "__main__":
    key = jax.random.PRNGKey(0)
    k_p, k_h, k_m = jax.random.split(key, 3)

    cfg = dict(hidden_size=32, num_heads=4, intermediate=64,
               max_v_len=8, max_t_len=8, eps=1e-12)
    B = 2
    L = cfg["max_v_len"] + cfg["max_t_len"]          # 16
    D = cfg["hidden_size"]
    M = 2                                            # existing memory slots

    params = init_params(k_p, D, cfg["intermediate"])
    hidden_states = jax.random.normal(k_h, (B, L, D), jnp.float32)
    prev_m = jax.random.normal(k_m, (B, L, M, D), jnp.float32)
    # valid-token mask over (B, L): batch 0 fully valid, batch 1 pads last 3 text tokens
    valid_lens = jnp.array([[L], [L - 3]], jnp.int32)
    attention_mask = (jnp.arange(L)[None, :] < valid_lens).astype(jnp.float32)

    updated_m, layer_out = bert_layer_with_memory(prev_m, hidden_states,
                                                  attention_mask, params, cfg)
    updated_m = jax.block_until_ready(updated_m)
    layer_out = jax.block_until_ready(layer_out)

    ref_m, ref_out = _reference_forward(prev_m, hidden_states, attention_mask, params, cfg)
    # bf16 MXU matmuls with f32 accumulation vs HIGHEST-precision f32 reference.
    np.testing.assert_allclose(np.asarray(updated_m), np.asarray(ref_m),
                               rtol=5e-2, atol=5e-2)
    np.testing.assert_allclose(np.asarray(layer_out), np.asarray(ref_out),
                               rtol=5e-2, atol=5e-2)
    print("KERNEL_OK")
</pallas_src>

<mosaic_0001>
module attributes {stable_mosaic.version = 11 : i64} {
  func.func @_attn_ffn_kernel(%arg0: i32, %arg1: memref<1x16x32xf32, #tpu.memory_space<vmem>>, %arg2: memref<1x1x16xf32, #tpu.memory_space<vmem>>, %arg3: memref<32x96xbf16, #tpu.memory_space<vmem>>, %arg4: memref<1x96xf32, #tpu.memory_space<vmem>>, %arg5: memref<4x8x32xbf16, #tpu.memory_space<vmem>>, %arg6: memref<1x32xf32, #tpu.memory_space<vmem>>, %arg7: memref<1x32xf32, #tpu.memory_space<vmem>>, %arg8: memref<1x32xf32, #tpu.memory_space<vmem>>, %arg9: memref<32x64xbf16, #tpu.memory_space<vmem>>, %arg10: memref<1x64xf32, #tpu.memory_space<vmem>>, %arg11: memref<64x32xbf16, #tpu.memory_space<vmem>>, %arg12: memref<1x32xf32, #tpu.memory_space<vmem>>, %arg13: memref<1x32xf32, #tpu.memory_space<vmem>>, %arg14: memref<1x32xf32, #tpu.memory_space<vmem>>, %arg15: memref<1x16x32xf32, #tpu.memory_space<vmem>>) attributes {dimension_semantics = [#tpu.dimension_semantics<parallel>], iteration_bounds = array<i64: 2>, scalar_prefetch = 0 : i64, scratch_operands = 0 : i64, tpu.core_type = #tpu.core_type<tc>, window_params = [{transform_indices = @transform_0, window_bounds = array<i64: 1, 16, 32>}, {transform_indices = @transform_1, window_bounds = array<i64: 1, 1, 16>}, {pipeline_mode = #tpu.pipeline_mode<synchronous>, transform_indices = @transform_2, window_bounds = array<i64: 32, 96>}, {pipeline_mode = #tpu.pipeline_mode<synchronous>, transform_indices = @transform_3, window_bounds = array<i64: 1, 96>}, {pipeline_mode = #tpu.pipeline_mode<synchronous>, transform_indices = @transform_4, window_bounds = array<i64: 4, 8, 32>}, {pipeline_mode = #tpu.pipeline_mode<synchronous>, transform_indices = @transform_5, window_bounds = array<i64: 1, 32>}, {pipeline_mode = #tpu.pipeline_mode<synchronous>, transform_indices = @transform_6, window_bounds = array<i64: 1, 32>}, {pipeline_mode = #tpu.pipeline_mode<synchronous>, transform_indices = @transform_7, window_bounds = array<i64: 1, 32>}, {pipeline_mode = #tpu.pipeline_mode<synchronous>, transform_indices = @transform_8, window_bounds = array<i64: 32, 64>}, {pipeline_mode = #tpu.pipeline_mode<synchronous>, transform_indices = @transform_9, window_bounds = array<i64: 1, 64>}, {pipeline_mode = #tpu.pipeline_mode<synchronous>, transform_indices = @transform_10, window_bounds = array<i64: 64, 32>}, {pipeline_mode = #tpu.pipeline_mode<synchronous>, transform_indices = @transform_11, window_bounds = array<i64: 1, 32>}, {pipeline_mode = #tpu.pipeline_mode<synchronous>, transform_indices = @transform_12, window_bounds = array<i64: 1, 32>}, {pipeline_mode = #tpu.pipeline_mode<synchronous>, transform_indices = @transform_13, window_bounds = array<i64: 1, 32>}, {transform_indices = @transform_14, window_bounds = array<i64: 1, 16, 32>}]} {
    %c0 = arith.constant 0 : index
    %c0_0 = arith.constant 0 : index
    %c0_1 = arith.constant 0 : index
    %0 = vector.load %arg1[%c0, %c0_0, %c0_1] : memref<1x16x32xf32, #tpu.memory_space<vmem>>, vector<1x16x32xf32>
    %1 = vector.shape_cast %0 : vector<1x16x32xf32> to vector<16x32xf32>
    %2 = arith.truncf %1 : vector<16x32xf32> to vector<16x32xbf16>
    %c0_2 = arith.constant 0 : index
    %c0_3 = arith.constant 0 : index
    %3 = vector.load %arg3[%c0_2, %c0_3] : memref<32x96xbf16, #tpu.memory_space<vmem>>, vector<32x96xbf16>
    %cst = arith.constant dense<0.000000e+00> : vector<16x96xf32>
    %4 = tpu.matmul %2, %3, %cst {dimension_numbers = #tpu.dot_dimension_numbers<[1], [0], [0], [1], [0, 0, 1, 1], [], []>} : vector<16x32xbf16>, vector<32x96xbf16>, vector<16x96xf32> -> vector<16x96xf32>
    %c0_4 = arith.constant 0 : index
    %c0_5 = arith.constant 0 : index
    %5 = vector.load %arg4[%c0_4, %c0_5] : memref<1x96xf32, #tpu.memory_space<vmem>>, vector<1x96xf32>
    %6 = vector.broadcast %5 : vector<1x96xf32> to vector<16x96xf32>
    %7 = arith.addf %4, %6 : vector<16x96xf32>
    %8 = vector.extract_strided_slice %7 {offsets = [0, 0], sizes = [16, 32], strides = [1, 1]} : vector<16x96xf32> to vector<16x32xf32>
    %9 = arith.truncf %8 : vector<16x32xf32> to vector<16x32xbf16>
    %10 = vector.extract_strided_slice %7 {offsets = [0, 32], sizes = [16, 32], strides = [1, 1]} : vector<16x96xf32> to vector<16x32xf32>
    %11 = arith.truncf %10 : vector<16x32xf32> to vector<16x32xbf16>
    %12 = vector.extract_strided_slice %7 {offsets = [0, 64], sizes = [16, 32], strides = [1, 1]} : vector<16x96xf32> to vector<16x32xf32>
    %13 = arith.truncf %12 : vector<16x32xf32> to vector<16x32xbf16>
    %c0_6 = arith.constant 0 : index
    %c0_7 = arith.constant 0 : index
    %c0_8 = arith.constant 0 : index
    %14 = vector.load %arg2[%c0_6, %c0_7, %c0_8] : memref<1x1x16xf32, #tpu.memory_space<vmem>>, vector<1x1x16xf32>
    %15 = vector.shape_cast %14 : vector<1x1x16xf32> to vector<1x16xf32>
    %16 = tpu.iota {dimensions = array<i32: 0>} : vector<16x16xi32>
    %17 = tpu.iota {dimensions = array<i32: 1>} : vector<16x16xi32>
    %c8_i32 = arith.constant 8 : i32
    %18 = vector.broadcast %c8_i32 : i32 to vector<16x16xi32>
    %19 = arith.cmpi slt, %17, %18 : vector<16x16xi32>
    %c8_i32_9 = arith.constant 8 : i32
    %20 = vector.broadcast %c8_i32_9 : i32 to vector<16x16xi32>
    %21 = arith.cmpi sge, %16, %20 : vector<16x16xi32>
    %22 = arith.cmpi sle, %17, %16 : vector<16x16xi32>
    %23 = arith.andi %21, %22 : vector<16x16xi1>
    %24 = arith.ori %19, %23 : vector<16x16xi1>
    %cst_10 = arith.constant 0.000000e+00 : f32
    %25 = vector.broadcast %cst_10 : f32 to vector<1x16xf32>
    %26 = arith.cmpf ogt, %15, %25 : vector<1x16xf32>
    %27 = vector.broadcast %26 : vector<1x16xi1> to vector<16x16xi1>
    %28 = arith.andi %24, %27 : vector<16x16xi1>
    %cst_11 = arith.constant 0.000000e+00 : f32
    %cst_12 = arith.constant -1.000000e+04 : f32
    %29 = vector.broadcast %cst_11 : f32 to vector<16x16xf32>
    %30 = vector.broadcast %cst_12 : f32 to vector<16x16xf32>
    %31 = arith.select %28, %29, %30 : vector<16x16xi1>, vector<16x16xf32>
    %32 = vector.extract_strided_slice %9 {offsets = [0, 0], sizes = [16, 8], strides = [1, 1]} : vector<16x32xbf16> to vector<16x8xbf16>
    %33 = vector.extract_strided_slice %9 {offsets = [0, 8], sizes = [16, 8], strides = [1, 1]} : vector<16x32xbf16> to vector<16x8xbf16>
    %34 = vector.extract_strided_slice %9 {offsets = [0, 16], sizes = [16, 8], strides = [1, 1]} : vector<16x32xbf16> to vector<16x8xbf16>
    %35 = vector.extract_strided_slice %9 {offsets = [0, 24], sizes = [16, 8], strides = [1, 1]} : vector<16x32xbf16> to vector<16x8xbf16>
    %36 = vector.shape_cast %32 : vector<16x8xbf16> to vector<1x16x8xbf16>
    %37 = vector.shape_cast %33 : vector<16x8xbf16> to vector<1x16x8xbf16>
    %38 = vector.shape_cast %34 : vector<16x8xbf16> to vector<1x16x8xbf16>
    %39 = vector.shape_cast %35 : vector<16x8xbf16> to vector<1x16x8xbf16>
    %40 = tpu.concatenate %36, %37, %38, %39 in 0 : vector<1x16x8xbf16>, vector<1x16x8xbf16>, vector<1x16x8xbf16>, vector<1x16x8xbf16> -> vector<4x16x8xbf16>
    %41 = vector.extract_strided_slice %11 {offsets = [0, 0], sizes = [16, 8], strides = [1, 1]} : vector<16x32xbf16> to vector<16x8xbf16>
    %42 = vector.extract_strided_slice %11 {offsets = [0, 8], sizes = [16, 8], strides = [1, 1]} : vector<16x32xbf16> to vector<16x8xbf16>
    %43 = vector.extract_strided_slice %11 {offsets = [0, 16], sizes = [16, 8], strides = [1, 1]} : vector<16x32xbf16> to vector<16x8xbf16>
    %44 = vector.extract_strided_slice %11 {offsets = [0, 24], sizes = [16, 8], strides = [1, 1]} : vector<16x32xbf16> to vector<16x8xbf16>
    %45 = vector.shape_cast %41 : vector<16x8xbf16> to vector<1x16x8xbf16>
    %46 = vector.shape_cast %42 : vector<16x8xbf16> to vector<1x16x8xbf16>
    %47 = vector.shape_cast %43 : vector<16x8xbf16> to vector<1x16x8xbf16>
    %48 = vector.shape_cast %44 : vector<16x8xbf16> to vector<1x16x8xbf16>
    %49 = tpu.concatenate %45, %46, %47, %48 in 0 : vector<1x16x8xbf16>, vector<1x16x8xbf16>, vector<1x16x8xbf16>, vector<1x16x8xbf16> -> vector<4x16x8xbf16>
    %50 = vector.extract_strided_slice %13 {offsets = [0, 0], sizes = [16, 8], strides = [1, 1]} : vector<16x32xbf16> to vector<16x8xbf16>
    %51 = vector.extract_strided_slice %13 {offsets = [0, 8], sizes = [16, 8], strides = [1, 1]} : vector<16x32xbf16> to vector<16x8xbf16>
    %52 = vector.extract_strided_slice %13 {offsets = [0, 16], sizes = [16, 8], strides = [1, 1]} : vector<16x32xbf16> to vector<16x8xbf16>
    %53 = vector.extract_strided_slice %13 {offsets = [0, 24], sizes = [16, 8], strides = [1, 1]} : vector<16x32xbf16> to vector<16x8xbf16>
    %54 = vector.shape_cast %50 : vector<16x8xbf16> to vector<1x16x8xbf16>
    %55 = vector.shape_cast %51 : vector<16x8xbf16> to vector<1x16x8xbf16>
    %56 = vector.shape_cast %52 : vector<16x8xbf16> to vector<1x16x8xbf16>
    %57 = vector.shape_cast %53 : vector<16x8xbf16> to vector<1x16x8xbf16>
    %58 = tpu.concatenate %54, %55, %56, %57 in 0 : vector<1x16x8xbf16>, vector<1x16x8xbf16>, vector<1x16x8xbf16>, vector<1x16x8xbf16> -> vector<4x16x8xbf16>
    "tpu.trace_start"() <{level = 10 : i32, message = "hqd,hkd->hqk"}> : () -> ()
    %cst_13 = arith.constant dense<0.000000e+00> : vector<4x16x16xf32>
    %59 = tpu.matmul %40, %49, %cst_13 {dimension_numbers = #tpu.dot_dimension_numbers<[2], [2], [1], [1], [0, 0, 0, 1, 1, 1], [0], [0]>} : vector<4x16x8xbf16>, vector<4x16x8xbf16>, vector<4x16x16xf32> -> vector<4x16x16xf32>
    "tpu.trace_stop"() : () -> ()
    %cst_14 = arith.constant 0.353553385 : f32
    %60 = vector.broadcast %cst_14 : f32 to vector<4x16x16xf32>
    %61 = arith.mulf %59, %60 : vector<4x16x16xf32>
    %62 = vector.shape_cast %31 : vector<16x16xf32> to vector<1x16x16xf32>
    %63 = vector.broadcast %62 : vector<1x16x16xf32> to vector<4x16x16xf32>
    %64 = arith.addf %61, %63 : vector<4x16x16xf32>
    %cst_15 = arith.constant dense<0xFF800000> : vector<4x16xf32>
    %65 = vector.multi_reduction <maximumf>, %64, %cst_15 [2] : vector<4x16x16xf32> to vector<4x16xf32>
    %66 = vector.shape_cast %65 : vector<4x16xf32> to vector<4x16x1xf32>
    %67 = vector.broadcast %66 : vector<4x16x1xf32> to vector<4x16x16xf32>
    %68 = arith.subf %64, %67 : vector<4x16x16xf32>
    %69 = math.exp %68 : vector<4x16x16xf32>
    %cst_16 = arith.constant dense<0.000000e+00> : vector<4x16xf32>
    %70 = vector.multi_reduction <add>, %69, %cst_16 [2] : vector<4x16x16xf32> to vector<4x16xf32>
    %71 = vector.shape_cast %70 : vector<4x16xf32> to vector<4x16x1xf32>
    %72 = tpu.reciprocal %71 {approx = true} : vector<4x16x1xf32> -> vector<4x16x1xf32>
    %73 = vector.broadcast %72 : vector<4x16x1xf32> to vector<4x16x16xf32>
    %74 = arith.mulf %69, %73 : vector<4x16x16xf32>
    %75 = arith.truncf %74 : vector<4x16x16xf32> to vector<4x16x16xbf16>
    "tpu.trace_start"() <{level = 10 : i32, message = "hqk,hkd->hqd"}> : () -> ()
    %cst_17 = arith.constant dense<0.000000e+00> : vector<4x16x8xf32>
    %76 = tpu.matmul %75, %58, %cst_17 {dimension_numbers = #tpu.dot_dimension_numbers<[2], [1], [1], [2], [0, 0, 0, 1, 1, 2], [0], [0]>} : vector<4x16x16xbf16>, vector<4x16x8xbf16>, vector<4x16x8xf32> -> vector<4x16x8xf32>
    "tpu.trace_stop"() : () -> ()
    %c0_18 = arith.constant 0 : index
    %c0_19 = arith.constant 0 : index
    %77 = vector.load %arg6[%c0_18, %c0_19] : memref<1x32xf32, #tpu.memory_space<vmem>>, vector<1x32xf32>
    %78 = vector.extract_strided_slice %76 {offsets = [0, 0, 0], sizes = [1, 16, 8], strides = [1, 1, 1]} : vector<4x16x8xf32> to vector<1x16x8xf32>
    %79 = vector.shape_cast %78 : vector<1x16x8xf32> to vector<16x8xf32>
    %80 = arith.truncf %79 : vector<16x8xf32> to vector<16x8xbf16>
    %c0_20 = arith.constant 0 : index
    %c0_21 = arith.constant 0 : index
    %c0_22 = arith.constant 0 : index
    %81 = vector.load %arg5[%c0_20, %c0_21, %c0_22] : memref<4x8x32xbf16, #tpu.memory_space<vmem>>, vector<1x8x32xbf16>
    %82 = vector.shape_cast %81 : vector<1x8x32xbf16> to vector<8x32xbf16>
    %cst_23 = arith.constant dense<0.000000e+00> : vector<16x32xf32>
    %83 = tpu.matmul %80, %82, %cst_23 {dimension_numbers = #tpu.dot_dimension_numbers<[1], [0], [0], [1], [0, 0, 1, 1], [], []>} : vector<16x8xbf16>, vector<8x32xbf16>, vector<16x32xf32> -> vector<16x32xf32>
    %84 = vector.broadcast %77 : vector<1x32xf32> to vector<16x32xf32>
    %85 = arith.addf %84, %83 : vector<16x32xf32>
    %86 = vector.extract_strided_slice %76 {offsets = [1, 0, 0], sizes = [1, 16, 8], strides = [1, 1, 1]} : vector<4x16x8xf32> to vector<1x16x8xf32>
    %87 = vector.shape_cast %86 : vector<1x16x8xf32> to vector<16x8xf32>
    %88 = arith.truncf %87 : vector<16x8xf32> to vector<16x8xbf16>
    %c1 = arith.constant 1 : index
    %c0_24 = arith.constant 0 : index
    %c0_25 = arith.constant 0 : index
    %89 = vector.load %arg5[%c1, %c0_24, %c0_25] : memref<4x8x32xbf16, #tpu.memory_space<vmem>>, vector<1x8x32xbf16>
    %90 = vector.shape_cast %89 : vector<1x8x32xbf16> to vector<8x32xbf16>
    %cst_26 = arith.constant dense<0.000000e+00> : vector<16x32xf32>
    %91 = tpu.matmul %88, %90, %cst_26 {dimension_numbers = #tpu.dot_dimension_numbers<[1], [0], [0], [1], [0, 0, 1, 1], [], []>} : vector<16x8xbf16>, vector<8x32xbf16>, vector<16x32xf32> -> vector<16x32xf32>
    %92 = arith.addf %85, %91 : vector<16x32xf32>
    %93 = vector.extract_strided_slice %76 {offsets = [2, 0, 0], sizes = [1, 16, 8], strides = [1, 1, 1]} : vector<4x16x8xf32> to vector<1x16x8xf32>
    %94 = vector.shape_cast %93 : vector<1x16x8xf32> to vector<16x8xf32>
    %95 = arith.truncf %94 : vector<16x8xf32> to vector<16x8xbf16>
    %c2 = arith.constant 2 : index
    %c0_27 = arith.constant 0 : index
    %c0_28 = arith.constant 0 : index
    %96 = vector.load %arg5[%c2, %c0_27, %c0_28] : memref<4x8x32xbf16, #tpu.memory_space<vmem>>, vector<1x8x32xbf16>
    %97 = vector.shape_cast %96 : vector<1x8x32xbf16> to vector<8x32xbf16>
    %cst_29 = arith.constant dense<0.000000e+00> : vector<16x32xf32>
    %98 = tpu.matmul %95, %97, %cst_29 {dimension_numbers = #tpu.dot_dimension_numbers<[1], [0], [0], [1], [0, 0, 1, 1], [], []>} : vector<16x8xbf16>, vector<8x32xbf16>, vector<16x32xf32> -> vector<16x32xf32>
    %99 = arith.addf %92, %98 : vector<16x32xf32>
    %100 = vector.extract_strided_slice %76 {offsets = [3, 0, 0], sizes = [1, 16, 8], strides = [1, 1, 1]} : vector<4x16x8xf32> to vector<1x16x8xf32>
    %101 = vector.shape_cast %100 : vector<1x16x8xf32> to vector<16x8xf32>
    %102 = arith.truncf %101 : vector<16x8xf32> to vector<16x8xbf16>
    %c3 = arith.constant 3 : index
    %c0_30 = arith.constant 0 : index
    %c0_31 = arith.constant 0 : index
    %103 = vector.load %arg5[%c3, %c0_30, %c0_31] : memref<4x8x32xbf16, #tpu.memory_space<vmem>>, vector<1x8x32xbf16>
    %104 = vector.shape_cast %103 : vector<1x8x32xbf16> to vector<8x32xbf16>
    %cst_32 = arith.constant dense<0.000000e+00> : vector<16x32xf32>
    %105 = tpu.matmul %102, %104, %cst_32 {dimension_numbers = #tpu.dot_dimension_numbers<[1], [0], [0], [1], [0, 0, 1, 1], [], []>} : vector<16x8xbf16>, vector<8x32xbf16>, vector<16x32xf32> -> vector<16x32xf32>
    %106 = arith.addf %99, %105 : vector<16x32xf32>
    %107 = arith.addf %106, %1 : vector<16x32xf32>
    %c0_33 = arith.constant 0 : index
    %c0_34 = arith.constant 0 : index
    %108 = vector.load %arg7[%c0_33, %c0_34] : memref<1x32xf32, #tpu.memory_space<vmem>>, vector<1x32xf32>
    %c0_35 = arith.constant 0 : index
    %c0_36 = arith.constant 0 : index
    %109 = vector.load %arg8[%c0_35, %c0_36] : memref<1x32xf32, #tpu.memory_space<vmem>>, vector<1x32xf32>
    %cst_37 = arith.constant dense<0.000000e+00> : vector<16xf32>
    %110 = vector.multi_reduction <add>, %107, %cst_37 [1] : vector<16x32xf32> to vector<16xf32>
    %111 = vector.shape_cast %110 : vector<16xf32> to vector<16x1xf32>
    %cst_38 = arith.constant 3.200000e+01 : f32
    %112 = vector.broadcast %cst_38 : f32 to vector<16x1xf32>
    %113 = arith.divf %111, %112 : vector<16x1xf32>
    %114 = vector.broadcast %113 : vector<16x1xf32> to vector<16x32xf32>
    %115 = arith.subf %107, %114 : vector<16x32xf32>
    %116 = arith.mulf %115, %115 : vector<16x32xf32>
    %cst_39 = arith.constant dense<0.000000e+00> : vector<16xf32>
    %117 = vector.multi_reduction <add>, %116, %cst_39 [1] : vector<16x32xf32> to vector<16xf32>
    %118 = vector.shape_cast %117 : vector<16xf32> to vector<16x1xf32>
    %cst_40 = arith.constant 3.200000e+01 : f32
    %119 = vector.broadcast %cst_40 : f32 to vector<16x1xf32>
    %120 = arith.divf %118, %119 : vector<16x1xf32>
    %cst_41 = arith.constant 9.99999996E-13 : f32
    %121 = vector.broadcast %cst_41 : f32 to vector<16x1xf32>
    %122 = arith.addf %120, %121 : vector<16x1xf32>
    %123 = math.rsqrt %122 : vector<16x1xf32>
    %124 = vector.broadcast %123 : vector<16x1xf32> to vector<16x32xf32>
    %125 = arith.mulf %115, %124 : vector<16x32xf32>
    %126 = vector.broadcast %108 : vector<1x32xf32> to vector<16x32xf32>
    %127 = arith.mulf %125, %126 : vector<16x32xf32>
    %128 = vector.broadcast %109 : vector<1x32xf32> to vector<16x32xf32>
    %129 = arith.addf %127, %128 : vector<16x32xf32>
    %130 = arith.truncf %129 : vector<16x32xf32> to vector<16x32xbf16>
    %c0_42 = arith.constant 0 : index
    %c0_43 = arith.constant 0 : index
    %131 = vector.load %arg9[%c0_42, %c0_43] : memref<32x64xbf16, #tpu.memory_space<vmem>>, vector<32x64xbf16>
    %cst_44 = arith.constant dense<0.000000e+00> : vector<16x64xf32>
    %132 = tpu.matmul %130, %131, %cst_44 {dimension_numbers = #tpu.dot_dimension_numbers<[1], [0], [0], [1], [0, 0, 1, 1], [], []>} : vector<16x32xbf16>, vector<32x64xbf16>, vector<16x64xf32> -> vector<16x64xf32>
    %c0_45 = arith.constant 0 : index
    %c0_46 = arith.constant 0 : index
    %133 = vector.load %arg10[%c0_45, %c0_46] : memref<1x64xf32, #tpu.memory_space<vmem>>, vector<1x64xf32>
    %134 = vector.broadcast %133 : vector<1x64xf32> to vector<16x64xf32>
    %135 = arith.addf %132, %134 : vector<16x64xf32>
    %cst_47 = arith.constant 0.000000e+00 : f32
    %136 = vector.broadcast %cst_47 : f32 to vector<16x64xf32>
    %137 = arith.maximumf %135, %136 : vector<16x64xf32>
    %138 = math.absf %135 : vector<16x64xf32>
    %cst_48 = arith.constant 0.000000e+00 : f32
    %139 = vector.broadcast %cst_48 : f32 to vector<16x64xf32>
    %140 = arith.subf %139, %138 : vector<16x64xf32>
    %141 = math.exp %140 : vector<16x64xf32>
    %cst_49 = arith.constant 1.000000e+00 : f32
    %142 = vector.broadcast %cst_49 : f32 to vector<16x64xf32>
    %143 = arith.addf %142, %141 : vector<16x64xf32>
    %144 = math.log %143 : vector<16x64xf32>
    %145 = arith.addf %137, %144 : vector<16x64xf32>
    %146 = math.tanh %145 : vector<16x64xf32>
    %147 = arith.mulf %135, %146 : vector<16x64xf32>
    %148 = arith.truncf %147 : vector<16x64xf32> to vector<16x64xbf16>
    %c0_50 = arith.constant 0 : index
    %c0_51 = arith.constant 0 : index
    %149 = vector.load %arg11[%c0_50, %c0_51] : memref<64x32xbf16, #tpu.memory_space<vmem>>, vector<64x32xbf16>
    %cst_52 = arith.constant dense<0.000000e+00> : vector<16x32xf32>
    %150 = tpu.matmul %148, %149, %cst_52 {dimension_numbers = #tpu.dot_dimension_numbers<[1], [0], [0], [1], [0, 0, 1, 1], [], []>} : vector<16x64xbf16>, vector<64x32xbf16>, vector<16x32xf32> -> vector<16x32xf32>
    %c0_53 = arith.constant 0 : index
    %c0_54 = arith.constant 0 : index
    %151 = vector.load %arg12[%c0_53, %c0_54] : memref<1x32xf32, #tpu.memory_space<vmem>>, vector<1x32xf32>
    %152 = vector.broadcast %151 : vector<1x32xf32> to vector<16x32xf32>
    %153 = arith.addf %150, %152 : vector<16x32xf32>
    %154 = arith.addf %153, %129 : vector<16x32xf32>
    %c0_55 = arith.constant 0 : index
    %c0_56 = arith.constant 0 : index
    %155 = vector.load %arg13[%c0_55, %c0_56] : memref<1x32xf32, #tpu.memory_space<vmem>>, vector<1x32xf32>
    %c0_57 = arith.constant 0 : index
    %c0_58 = arith.constant 0 : index
    %156 = vector.load %arg14[%c0_57, %c0_58] : memref<1x32xf32, #tpu.memory_space<vmem>>, vector<1x32xf32>
    %cst_59 = arith.constant dense<0.000000e+00> : vector<16xf32>
    %157 = vector.multi_reduction <add>, %154, %cst_59 [1] : vector<16x32xf32> to vector<16xf32>
    %158 = vector.shape_cast %157 : vector<16xf32> to vector<16x1xf32>
    %cst_60 = arith.constant 3.200000e+01 : f32
    %159 = vector.broadcast %cst_60 : f32 to vector<16x1xf32>
    %160 = arith.divf %158, %159 : vector<16x1xf32>
    %161 = vector.broadcast %160 : vector<16x1xf32> to vector<16x32xf32>
    %162 = arith.subf %154, %161 : vector<16x32xf32>
    %163 = arith.mulf %162, %162 : vector<16x32xf32>
    %cst_61 = arith.constant dense<0.000000e+00> : vector<16xf32>
    %164 = vector.multi_reduction <add>, %163, %cst_61 [1] : vector<16x32xf32> to vector<16xf32>
    %165 = vector.shape_cast %164 : vector<16xf32> to vector<16x1xf32>
    %cst_62 = arith.constant 3.200000e+01 : f32
    %166 = vector.broadcast %cst_62 : f32 to vector<16x1xf32>
    %167 = arith.divf %165, %166 : vector<16x1xf32>
    %cst_63 = arith.constant 9.99999996E-13 : f32
    %168 = vector.broadcast %cst_63 : f32 to vector<16x1xf32>
    %169 = arith.addf %167, %168 : vector<16x1xf32>
    %170 = math.rsqrt %169 : vector<16x1xf32>
    %171 = vector.broadcast %170 : vector<16x1xf32> to vector<16x32xf32>
    %172 = arith.mulf %162, %171 : vector<16x32xf32>
    %173 = vector.broadcast %155 : vector<1x32xf32> to vector<16x32xf32>
    %174 = arith.mulf %172, %173 : vector<16x32xf32>
    %175 = vector.broadcast %156 : vector<1x32xf32> to vector<16x32xf32>
    %176 = arith.addf %174, %175 : vector<16x32xf32>
    %c0_64 = arith.constant 0 : index
    %c0_65 = arith.constant 0 : index
    %c0_66 = arith.constant 0 : index
    %177 = vector.load %arg15[%c0_64, %c0_65, %c0_66] : memref<1x16x32xf32, #tpu.memory_space<vmem>>, vector<1x16x32xf32>
    %178 = vector.shape_cast %177 : vector<1x16x32xf32> to vector<16x32xf32>
    %179 = vector.shape_cast %176 : vector<16x32xf32> to vector<1x16x32xf32>
    tpu.vector_store %arg15[%c0_64, %c0_65, %c0_66], %179 {strides = array<i32>} : memref<1x16x32xf32, #tpu.memory_space<vmem>>, vector<1x16x32xf32>,
    return
  }
  func.func @transform_0(%arg0: i32) -> (i32, i32, i32) {
    %c0_i32 = arith.constant 0 : i32
    %c0_i32_0 = arith.constant 0 : i32
    %c0_i32_1 = arith.constant 0 : i32
    return %arg0, %c0_i32, %c0_i32_0 : i32, i32, i32
  }
  func.func @transform_1(%arg0: i32) -> (i32, i32, i32) {
    %c0_i32 = arith.constant 0 : i32
    %c0_i32_0 = arith.constant 0 : i32
    %c0_i32_1 = arith.constant 0 : i32
    return %arg0, %c0_i32, %c0_i32_0 : i32, i32, i32
  }
  func.func @transform_2(%arg0: i32) -> (i32, i32) {
    %c0_i32 = arith.constant 0 : i32
    %c0_i32_0 = arith.constant 0 : i32
    %c0_i32_1 = arith.constant 0 : i32
    return %c0_i32, %c0_i32_0 : i32, i32
  }
  func.func @transform_3(%arg0: i32) -> (i32, i32) {
    %c0_i32 = arith.constant 0 : i32
    %c0_i32_0 = arith.constant 0 : i32
    %c0_i32_1 = arith.constant 0 : i32
    return %c0_i32, %c0_i32_0 : i32, i32
  }
  func.func @transform_4(%arg0: i32) -> (i32, i32, i32) {
    %c0_i32 = arith.constant 0 : i32
    %c0_i32_0 = arith.constant 0 : i32
    %c0_i32_1 = arith.constant 0 : i32
    %c0_i32_2 = arith.constant 0 : i32
    return %c0_i32, %c0_i32_0, %c0_i32_1 : i32, i32, i32
  }
  func.func @transform_5(%arg0: i32) -> (i32, i32) {
    %c0_i32 = arith.constant 0 : i32
    %c0_i32_0 = arith.constant 0 : i32
    %c0_i32_1 = arith.constant 0 : i32
    return %c0_i32, %c0_i32_0 : i32, i32
  }
  func.func @transform_6(%arg0: i32) -> (i32, i32) {
    %c0_i32 = arith.constant 0 : i32
    %c0_i32_0 = arith.constant 0 : i32
    %c0_i32_1 = arith.constant 0 : i32
    return %c0_i32, %c0_i32_0 : i32, i32
  }
  func.func @transform_7(%arg0: i32) -> (i32, i32) {
    %c0_i32 = arith.constant 0 : i32
    %c0_i32_0 = arith.constant 0 : i32
    %c0_i32_1 = arith.constant 0 : i32
    return %c0_i32, %c0_i32_0 : i32, i32
  }
  func.func @transform_8(%arg0: i32) -> (i32, i32) {
    %c0_i32 = arith.constant 0 : i32
    %c0_i32_0 = arith.constant 0 : i32
    %c0_i32_1 = arith.constant 0 : i32
    return %c0_i32, %c0_i32_0 : i32, i32
  }
  func.func @transform_9(%arg0: i32) -> (i32, i32) {
    %c0_i32 = arith.constant 0 : i32
    %c0_i32_0 = arith.constant 0 : i32
    %c0_i32_1 = arith.constant 0 : i32
    return %c0_i32, %c0_i32_0 : i32, i32
  }
  func.func @transform_10(%arg0: i32) -> (i32, i32) {
    %c0_i32 = arith.constant 0 : i32
    %c0_i32_0 = arith.constant 0 : i32
    %c0_i32_1 = arith.constant 0 : i32
    return %c0_i32, %c0_i32_0 : i32, i32
  }
  func.func @transform_11(%arg0: i32) -> (i32, i32) {
    %c0_i32 = arith.constant 0 : i32
    %c0_i32_0 = arith.constant 0 : i32
    %c0_i32_1 = arith.constant 0 : i32
    return %c0_i32, %c0_i32_0 : i32, i32
  }
  func.func @transform_12(%arg0: i32) -> (i32, i32) {
    %c0_i32 = arith.constant 0 : i32
    %c0_i32_0 = arith.constant 0 : i32
    %c0_i32_1 = arith.constant 0 : i32
    return %c0_i32, %c0_i32_0 : i32, i32
  }
  func.func @transform_13(%arg0: i32) -> (i32, i32) {
    %c0_i32 = arith.constant 0 : i32
    %c0_i32_0 = arith.constant 0 : i32
    %c0_i32_1 = arith.constant 0 : i32
    return %c0_i32, %c0_i32_0 : i32, i32
  }
  func.func @transform_14(%arg0: i32) -> (i32, i32, i32) {
    %c0_i32 = arith.constant 0 : i32
    %c0_i32_0 = arith.constant 0 : i32
    %c0_i32_1 = arith.constant 0 : i32
    return %arg0, %c0_i32, %c0_i32_0 : i32, i32, i32
  }
}

</mosaic_0001>

<bundles_post_ra>
// kernel: tpu_custom_call.1
= control target key start
LH: loop header
LB: loop body
LE: loop exit
PB: predicated region body
PF: predicated region fallthrough
CT: control target
= control target key end

     0   :  { %s2595_s0 = inlined_call_operand.vmem [shape: f32[2,16,32], index: 0, kind: input, shape index: {}]   ;;  %s2596_s1 = inlined_call_operand.vmem [shape: f32[2,1,16], index: 1, kind: input, shape index: {}]   ;;  %s2597_s2 = inlined_call_operand.vmem [shape: bf16[32,96], index: 2, kind: input, shape index: {}]   ;;  %s2598_s3 = inlined_call_operand.vmem [shape: f32[1,96], index: 3, kind: input, shape index: {}]   ;;  %s2599_s4 = inlined_call_operand.hbm [shape: bf16[4,8,32], index: 4, kind: input, shape index: {}]   ;;  %s2600_s5 = inlined_call_operand.vmem [shape: f32[1,32], index: 5, kind: input, shape index: {}]   ;;  %s2601_s6 = inlined_call_operand.vmem [shape: f32[1,32], index: 6, kind: input, shape index: {}]   ;;  %s2602_s7 = inlined_call_operand.vmem [shape: f32[1,32], index: 7, kind: input, shape index: {}]   ;;  %s2603_s8 = inlined_call_operand.hbm [shape: bf16[32,64], index: 8, kind: input, shape index: {}]   ;;  %s2604_s9 = inlined_call_operand.vmem [shape: f32[1,64], index: 9, kind: input, shape index: {}]   ;;  %s2605_s10 = inlined_call_operand.vmem [shape: bf16[64,32], index: 10, kind: input, shape index: {}]   ;;  %s2606_s11 = inlined_call_operand.vmem [shape: f32[1,32], index: 11, kind: input, shape index: {}]   ;;  %s2607_s12 = inlined_call_operand.vmem [shape: f32[1,32], index: 12, kind: input, shape index: {}]   ;;  %s2608_s13 = inlined_call_operand.vmem [shape: f32[1,32], index: 13, kind: input, shape index: {}]   ;;  %s2609_s14 = inlined_call_operand.hbm [shape: f32[2,16,32], index: 14, kind: output, shape index: {}]  }
   0x1   :  { %2622 = sst [smem:[#allocation18_spill]] %s2609_s14 }
   0x2   :  { %19 = vsyncpa [#allocation3], 0 }
   0x3   :  { %20 = vsyncpa [#allocation6], 0 }
   0x4   :  { %21 = vsyncpa [#allocation4], 0 }
   0x5   :  { %23 = vsyncpa [#allocation4 + $0x1], 0  ;;  %s2238_s29 = smov 0   ;;  %s2240_s30 = smov 0  }
   0x6   :  { %s2242_s15 = smov 0   ;;  %s2244_s16 = smov 0  }
   0x7 LB: > { %2623 = sst [smem:[#allocation11_spill]] %s2133_s29  ;;  %s2259_s17 = sadd.s32 4294967295, %s2145_s16   ;;  %s2145_s16 = sphi %s2244_s16, %s2646_s16   ;;  %s2141_s15 = sphi %s2242_s15, %s2648_s15   ;;  %s2137_s30 = sphi %s2240_s30, %s2650_s30   ;;  %s2133_s29 = sphi %s2238_s29, %s2649_s29  }
   0x8   : > { %2624 = sst [smem:[#allocation12_spill]] %s2141_s15  ;;  %s1702_s18 = sadd.s32 4294967294, %s2145_s16  }
   0x9   : > { %2625 = sst [smem:[#allocation13_spill]] %s2145_s16  ;;  %s2263_s19 = sadd.s32 1, %s2145_s16  }
   0xa   : > { %2626 = sst [smem:[#allocation14_spill]] %s2263_s19  ;;  %s340_s20 = sadd.s32 1, %s2141_s15 }
   0xb   : > { %s337_s21 = ssub.s32 %s2145_s16, %s2263_s19  ;;  %p350_p0 = scmp.ne.s32.totalorder %s2141_s15, %s2137_s30 }
   0xc   : > { %p338_p1 = scmp.eq.s32.totalorder %s337_s21, 0  ;;  %p351_p2 = scmp.eq.s32.totalorder %s2259_s17, 1 }
   0xd   : > { %p356_p3 = scmp.ne.s32.totalorder %s2137_s30, %s2133_s29  ;;  %p357_p4 = scmp.eq.s32.totalorder %s1702_s18, 1 }
   0xe   : > { %s2274_s22 = scalar_select %p338_p1, %s2141_s15, %s340_s20  }
   0xf   : > { %p2276_p5 = por %p351_p2, %p350_p0  ;;  %p2280_p6 = por %p357_p4, %p356_p3 }
  0x10   : > { %2627 = sst [smem:[#allocation15_spill]] %s2274_s22  ;;  %p1703_p7 = scmp.ge.s32.totalorder %s2145_s16, 1 }
  0x11   : > { %s2628_s23 = scalar_select %p2276_p5, 1, 0 }
  0x12   : > { %s2630_s24 = scalar_select %p2280_p6, 1, 0 }
  0x13   : > { %2629 = sst [smem:[#allocation16_spill]] %s2628_s23  ;;  %p364_p8 = scmp.lt.s32.totalorder %s2145_s16, 3 }
  0x14   : > { %2631 = sst [smem:[#allocation17_spill]] %s2630_s24  ;;  %p2615_p9 = scmp.eq.s32.totalorder %s2259_s17, 0 }
  0x15   : > { %p2287_p10 = pnand %p1703_p7, %p364_p8  ;;  %s2147_s26 = smov [#allocation2]  }
  0x16   : > { %s382_s27 = sshll.u32 %s2147_s26, 4  ;;  %s2148_s18 = smov [#allocation5]   ;;  %s383_s27 = int_to_ptr.vmem [resolvable:$true] %s382_s27 }
  0x17   : > { %s2632_s25 = scalar_select %p2287_p10, 1, 0 }
  0x18   : > { %p1896_p11 = pneg %p2287_p10  ;;  %s404_s20 = sshll.u32 %s2148_s18, 4  ;;  %s2299_s20 = int_to_ptr.vmem [resolvable:$true] %s404_s20 }
  0x19   : > { %s2019_s15 = scalar_lea.hbm %s2599_s4, 256 }
  0x1a   : > { %p2295_p12 = pnand %p2615_p9, %p1896_p11  ;;  %p2020_p13 = scmp.ne.s32.totalorder %s2599_s4, %s2019_s15 }
  0x1b   : > { %p2026_p3 = scmp.lt.u32.totalorder %s2019_s15, %s2599_s4 }
  0x1c   : > { %p2021_p0 = pneg %p2295_p12 }
  0x1e   : > { %p2022_p1 = pnand %p2021_p0, %p2020_p13 }
  0x20   : > { %p2023_p2 = pneg %p2022_p1 }
  0x22   : > { %p2028_p4 = pnand %p2026_p3, %p2023_p2 }
  0x24   : > { %2031 = shalt.err (!%p2028_p4)
}
  0x25   : > { %s2032_s18 = scalar_lea.vmem %s383_s27, 256  ;;  %p2040_p9 = scmp.lt.s32.totalorder %s383_s27, %s383_s27 }
  0x26   : > { %p2033_p7 = scmp.ne.s32.totalorder %s383_s27, %s2032_s18  ;;  %p2041_p6 = scmp.lt.s32.totalorder %s2032_s18, %s2032_s18 }
  0x28   : > { %p2035_p8 = pnand %p2033_p7, %p2021_p0  ;;  %p2042_p5 = por %p2041_p6, %p2040_p9 }
  0x2a   : > { %p2036_p11 = pneg %p2035_p8 }
  0x2c   : > { %p2043_p10 = pnand %p2042_p5, %p2036_p11 }
  0x2e   : > { %2046 = shalt.err (!%p2043_p10)
}
  0x2f   : > { %s2149_s19 = smov 64   ;;  %s2150_s22 = smov 4  }
  0x30   : > { %1899 = dma.hbm_to_vmem [thread:$0]  (!%p2295_p12), %s2599_s4, 256, %s383_s27, [#allocation3], %s2149_s19, %s2149_s19, %s2150_s22  }
  0x31   : > { %s2047_s26 = scalar_lea.hbm %s2603_s8, 256 }
  0x32   : > { %p2048_p13 = scmp.ne.s32.totalorder %s2603_s8, %s2047_s26  ;;  %p2054_p9 = scmp.lt.u32.totalorder %s2047_s26, %s2603_s8 }
  0x34   : > { %p2050_p5 = pnand %p2048_p13, %p2021_p0 }
  0x36   : > { %p2051_p6 = pneg %p2050_p5 }
  0x38   : > { %p2056_p10 = pnand %p2054_p9, %p2051_p6 }
  0x3a   : > { %2059 = shalt.err (!%p2056_p10)
}
  0x3b   : > { %s2060_s27 = scalar_lea.vmem %s2299_s20, 256  ;;  %p2068_p4 = scmp.lt.s32.totalorder %s2299_s20, %s2299_s20 }
  0x3c   : > { %p2061_p1 = scmp.ne.s32.totalorder %s2299_s20, %s2060_s27  ;;  %p2069_p7 = scmp.lt.s32.totalorder %s2060_s27, %s2060_s27 }
  0x3e   : > { %p2063_p2 = pnand %p2061_p1, %p2021_p0  ;;  %p2070_p8 = por %p2069_p7, %p2068_p4 }
  0x40   : > { %p2064_p3 = pneg %p2063_p2 }
  0x42   : > { %p2071_p11 = pnand %p2070_p8, %p2064_p3 }
  0x44   : > { %2074 = shalt.err (!%p2071_p11)
}
  0x45   : > { %1902 = dma.hbm_to_vmem [thread:$0]  (!%p2295_p12), %s2603_s8, 256, %s2299_s20, [#allocation6], %s2149_s19, %s2149_s19, %s2150_s22  }
  0x46   : > { %p2634_p13 = scmp.ne.s32.totalorder %s2632_s25, 0 }
  0x47   : > { %p2635_p5 = scmp.eq.s32.totalorder (!%p2634_p13), %s2259_s17, 0 }
  0x48   : > { %449 = sbr.rel (%p2634_p13) target bundleno = 2652 (0xa5c), region = 76 }
  0x4f   : > { %2120 = dma.done.wait (%p2635_p5), [#allocation3], 256   ;;  %p2636_p0 = pmov %p2635_p5 }
  0x51   : > { %2122 = vsyncadd (%p2636_p0), [#allocation3], 4294967040  ;;  %p2637_p6 = pmov %p2636_p0 }
  0x52   : > { %p2638_p9 = pmov %p2636_p0 }
  0x53   : > { %2124 = dma.done.wait (%p2637_p6), [#allocation6], 256  }
  0x54   : > { %2126 = vsyncadd (%p2638_p9), [#allocation6], 4294967040  ;;  %p502_p10 = scmp.lt.s32.totalorder %s2259_s17, 1  ;;  %v2151_v0 = vmov 0.0   ;;  %vm2152_vm0 = vmmov 0   ;;  %v1959_v1 = vld [vmem:[%s2597_s2] sm:$0xff]   ;;  %v584_v25 = vlaneseq }
  0x55   : > { %1786 = vmatprep.subr.bf16.mxu1 %v2151_v0  ;;  %1790 = vmatprep.mubr.msk.bf16.mxu1 %vm2152_vm0, %v2151_v0  ;;  %v1960_v2 = vld [vmem:[%s2597_s2 + $0x8] sm:$0xff]   ;;  %vm537_vm1 = vcmask 261120   ;;  %v1713_v6 = vld [vmem:[%s2598_s3] ss:$0 sm:$0xff]  ;;  %s2153_s18 = smov 104   ;;  %s2154_s27 = smov 120  }
  0x56   : > { %s2363_s23 = scalar_select %p502_p10, %s2259_s17, 1  ;;  %1800 = vmatprep.subr.bf16.mxu0 %v2151_v0  ;;  %1802 = vmatprep.mubr.msk.bf16.mxu0 %vm2152_vm0, %v2151_v0  ;;  %vm618_vm2 = vcmask 64512   ;;  %v585_v27 = vshrl.u32 %v584_v25, 7  ;;  %v2157_v29 = vmov 0   ;;  %v588_v31 = vand.u32 127, %v584_v25 }
  0x57   : > { %1787 = vmatpush3.bf16.msra.mxu1 %v1959_v1  ;;  %s2155_s14 = smov 96   ;;  %s2156_s16 = smov 112   ;;  %v2158_v35 = vmov -10000.0   ;;  %vm829_vm10 = vcmask 130048   ;;  %vm1116_vm11 = vcmask 1043456   ;;  %vm1502_vm12 = vcmask 523264  }
  0x58   : > { %s1749_s25 = sshll.u32 %s2363_s23, 4  ;;  %1788 = vmatprep.subr.bf16.mxu1 %v2151_v0  ;;  %s509_s20 = scalar_lea.vmem %s2596_s1, %s2363_s23  ;;  %v602_v28 = vsub.s32 0, %v585_v27  ;;  %v586_v32 = vadd.s32 8, %v585_v27  ;;  %vm589_vm4 = vcmp.lt.s32.totalorder %v588_v31, 8 }
  0x59   : > { %s506_s19 = scalar_lea.vmem %s2595_s0, %s1749_s25  ;;  %v583_v26 = vld [vmem:[%s509_s20] sm:$0x1]  ;;  %s2159_s23 = smov 64  }
  0x5a   : > { %v2378_v3 = vld [vmem:[%s506_s19] sm:$0xff]  ;;  %v2380_v4 = vld [vmem:[%s506_s19 + $0x8] sm:$0xff]  ;;  %vm598_vm3 = vcmp.gt.f32.partialorder %v583_v26, 0.0  ;;  %vm593_vm5 = vcmp.le.s32.totalorder %v588_v31, %v586_v32  ;;  %s499_s15 = sand.u32 1, %s2137_s30   ;;  %s2640_s19 = sld [smem:[#allocation18_spill]] }
  0x5b   : > { %v513_v5 = vpack.c.bf16 %v2380_v4, %v2378_v3  ;;  %1789 = vmatpush3.bf16.msra.mxu1 %v1960_v2  ;;  %v599_v30 = vsel %vm598_vm3, 1, %v2157_v29  ;;  %vm597_vm7 = vmor %vm589_vm4, %vm593_vm5  ;;  %s1710_s24 = sshll.u32 %s499_s15, 4 }
  0x5c   : > { %1794 = vmatprep.subr.bf16.mxu1 %v2151_v0  ;;  %v603_v33 = vrot.slane %v599_v30, %v602_v28  ;;  %s501_s25 = scalar_lea.vmem [#allocation7], %s1710_s24  ;;  %s2160_s24 = smov [#allocation7]  }
  0x5d   : > { %s1609_s28 = sshll.u32 %s501_s25, 4  ;;  %s2079_s21 = sshll.u32 %s2160_s24, 4  ;;  %s2550_s28 = int_to_ptr.vmem [resolvable:$true] %s1609_s28  ;;  %s2080_s21 = int_to_ptr.vmem [resolvable:$false] %s2079_s21 }
  0x5e   : > { %1791 = vmatmul.mubr.msk.bf16.vlgmr.msra.gmra.mrb[0].mxu1 %vm537_vm1, %v513_v5  ;;  %vm604_vm6 = vcmp.eq.s32.totalorder %v603_v33, 1  ;;  %s2075_s29 = scalar_lea.vmem %s2550_s28, 256  ;;  %s2081_s26 = scalar_lea.vmem %s2080_s21, 512 }
  0x5f   : > { %1796 = vmatprep.mubr.msk.bf16.mxu1 %vm2152_vm0, %v2151_v0  ;;  %vm605_vm8 = vmand %vm589_vm4, %vm604_vm6  ;;  %p2076_p12 = scmp.ne.s32.totalorder %s2550_s28, %s2075_s29  ;;  %p2082_p4 = scmp.lt.s32.totalorder %s2550_s28, %s2080_s21 }
  0x60   : > { %vm606_vm9 = vmand %vm597_vm7, %vm604_vm6  ;;  %v607_v36 = vsel %vm605_vm8, 0.0, %v2158_v35  ;;  %p2083_p7 = scmp.lt.s32.totalorder %s2081_s26, %s2075_s29 }
  0x61   : > { %v608_v40 = vsel %vm606_vm9, 0.0, %v2158_v35 }
  0x62   : > { %p2084_p8 = por %p2083_p7, %p2082_p4 }
 0x131   : > { %v575_v7 = vpop.f32.mrb[0].mxu1 }
 0x132   : > { %v1792_v8 = vpop.f32.mrb[1].mxu1  ;;  %v576_v10 = vadd.f32 %v1713_v6, %v575_v7 }
 0x133   : > { %v578_v9 = vpop.f32.mrb[2].mxu1 }
 0x134   : > { %v579_v11 = vadd.f32 %v1713_v6, %v578_v9  ;;  %v1793_v12 = vpop.f32.mrb[3].mxu1 }
 0x136   : > { %v2392_v13 = vpack.c.bf16 %v579_v11, %v576_v10 }
 0x138   : > { %614 = vrot.lane.b32.xlu1 %v2392_v13, %s2153_s18  ;;  %610 = vrot.lane.b32.xlu0 %v2392_v13, %s2154_s27 }
 0x13c   : > { %616 = vrot.lane.b32.xlu1 %v2392_v13, %s2155_s14  ;;  %612 = vrot.lane.b32.xlu0 %v2392_v13, %s2156_s16  ;;  %s1750_s16 = sshll.u32 %s2259_s17, 8  ;;  %s2554_s17 = scalar_lea.sflag [#allocation4], %s499_s15 }
 0x13d   : > { %s2548_s22 = scalar_lea.hbm %s2640_s19, %s1750_s16 }
 0x1aa   : > { %v2398_v14 = vpop.permute.xlu1 %614  ;;  %v2400_v15 = vpop.permute.xlu0 %610 }
 0x1ab   : > { %666 = vrot.lane.b32.xlu0 %v2400_v15, %s2155_s14 }
 0x1ae   : > { %v617_v16 = vpop.permute.xlu1 %616  ;;  %v2403_v17 = vpop.permute.xlu0 %612 }
 0x1af   : > { %v623_v18 = vsel %vm618_vm2, %v617_v16, 0  ;;  %764 = vrot.lane.b32.xlu0 %v2398_v14, %s2155_s14  ;;  %715 = vrot.lane.b32.xlu1 %v2403_v17, %s2155_s14  ;;  %s2639_s14 = sld [smem:[#allocation16_spill]] }
 0x1b0   : > { %1795 = vmatpush3.bf16.xpose.msra.mxu1 %v623_v18 }
 0x1b1   : > { %1806 = vmatprep.subr.bf16.mxu1 %v2151_v0 }
 0x1b5   : > { %p2641_p1 = scmp.ne.s32.totalorder %s2639_s14, 0 }
 0x1b7   : > { %1797 = vmatmul.mubr.msk.bf16.vlgmr.msra.gmra.mrb[4].mxu1 %vm618_vm2, %v2392_v13  ;;  %p2077_p2 = pnand %p2076_p12, %p2641_p1 }
 0x1b8   : > { %1808 = vmatprep.mubr.msk.bf16.mxu1 %vm2152_vm0, %v2151_v0 }
 0x1b9   : > { %p2078_p3 = pneg %p2077_p2 }
 0x1bb   : > { %p2085_p11 = pnand %p2084_p8, %p2078_p3 }
 0x21d   : > { %v667_v19 = vpop.permute.xlu0 %666 }
 0x21e   : > { %v672_v20 = vsel %vm618_vm2, %v667_v19, 0 }
 0x21f   : > { %1801 = vmatpush3.bf16.xpose.msra.mxu0 %v672_v20 }
 0x220   : > { %1812 = vmatprep.subr.bf16.mxu0 %v2151_v0 }
 0x221   : > { %v716_v21 = vpop.permute.xlu1 %715  ;;  %v765_v23 = vpop.permute.xlu0 %764 }
 0x222   : > { %v721_v22 = vsel %vm618_vm2, %v716_v21, 0  ;;  %v770_v24 = vsel %vm618_vm2, %v765_v23, 0 }
 0x223   : > { %1807 = vmatpush3.bf16.xpose.msra.mxu1 %v721_v22 }
 0x224   : > { %1818 = vmatprep.subr.bf16.mxu1 %v2151_v0 }
 0x226   : > { %1803 = vmatmul.mubr.msk.bf16.vlgmr.msra.gmra.mrb[0].mxu0 %vm618_vm2, %v2400_v15 }
 0x227   : > { %1813 = vmatpush3.bf16.xpose.msra.mxu0 %v770_v24  ;;  %1814 = vmatprep.mubr.msk.bf16.mxu0 %vm2152_vm0, %v2151_v0 }
 0x228   : > { %1824 = vmatprep.subr.bf16.mxu0 %v2151_v0 }
 0x22a   : > { %1809 = vmatmul.mubr.msk.bf16.vlgmr.msra.gmra.mrb[8].mxu1 %vm618_vm2, %v2403_v17 }
 0x22b   : > { %1820 = vmatprep.mubr.msk.bf16.mxu1 %vm2152_vm0, %v2151_v0 }
 0x22e   : > { %1815 = vmatmul.mubr.msk.bf16.vlgmr.msra.gmra.mrb[4].mxu0 %vm618_vm2, %v2398_v14 }
 0x22f   : > { %1826 = vmatprep.mubr.msk.bf16.mxu0 %vm2152_vm0, %v2151_v0 }
 0x28a   : > { %v659_v34 = vpop.f32.mrb[4].mxu1 }
 0x28b   : > { %v813_v37 = vmul.f32 0.35355338, %v659_v34  ;;  %v1798_v38 = vpop.f32.mrb[5].mxu1 }
 0x28c   : > { %v662_v39 = vpop.f32.mrb[6].mxu1 }
 0x28d   : > { %v814_v41 = vmul.f32 0.35355338, %v662_v39  ;;  %v1799_v42 = vpop.f32.mrb[7].mxu1  ;;  %v821_v43 = vadd.f32 %v813_v37, %v607_v36 }
 0x28f   : > { %v830_v44 = vsel %vm829_vm10, %v821_v43, -inf  ;;  %v822_v45 = vadd.f32 %v814_v41, %v608_v40 }
 0x290   : > { %831 = vmax.xlane.f32.xlu1 %v830_v44 }
 0x291   : > { %v833_v46 = vsel %vm829_vm10, %v822_v45, -inf }
 0x292   : > { %834 = vmax.xlane.f32.xlu0 %v833_v46 }
 0x2f9   : > { %v708_v47 = vpop.f32.mrb[0].mxu0 }
 0x2fa   : > { %v815_v48 = vmul.f32 0.35355338, %v708_v47  ;;  %v1804_v49 = vpop.f32.mrb[1].mxu0 }
 0x2fb   : > { %v711_v50 = vpop.f32.mrb[2].mxu0 }
 0x2fc   : > { %v816_v51 = vmul.f32 0.35355338, %v711_v50  ;;  %v1805_v52 = vpop.f32.mrb[3].mxu0  ;;  %v823_v53 = vadd.f32 %v815_v48, %v607_v36 }
 0x2fd   : > { %v757_v54 = vpop.f32.mrb[8].mxu1 }
 0x2fe   : > { %v817_v55 = vmul.f32 0.35355338, %v757_v54  ;;  %v1810_v56 = vpop.f32.mrb[9].mxu1  ;;  %v836_v57 = vsel %vm829_vm10, %v823_v53, -inf  ;;  %v824_v58 = vadd.f32 %v816_v51, %v608_v40 }
 0x2ff   : > { %837 = vmax.xlane.f32.xlu0 %v836_v57  ;;  %v760_v59 = vpop.f32.mrb[10].mxu1 }
 0x300   : > { %v818_v60 = vmul.f32 0.35355338, %v760_v59  ;;  %v1811_v61 = vpop.f32.mrb[11].mxu1  ;;  %v839_v62 = vsel %vm829_vm10, %v824_v58, -inf  ;;  %v825_v63 = vadd.f32 %v817_v55, %v607_v36 }
 0x301   : > { %v806_v1 = vpop.f32.mrb[4].mxu0  ;;  %840 = vmax.xlane.f32.xlu1 %v839_v62 }
 0x302   : > { %v819_v2 = vmul.f32 0.35355338, %v806_v1  ;;  %v1816_v5 = vpop.f32.mrb[5].mxu0  ;;  %v842_v6 = vsel %vm829_vm10, %v825_v63, -inf  ;;  %v826_v7 = vadd.f32 %v818_v60, %v608_v40 }
 0x303   : > { %v809_v8 = vpop.f32.mrb[6].mxu0  ;;  %843 = vmax.xlane.f32.xlu0 %v842_v6 }
 0x304   : > { %v820_v9 = vmul.f32 0.35355338, %v809_v8  ;;  %v1817_v10 = vpop.f32.mrb[7].mxu0  ;;  %v845_v11 = vsel %vm829_vm10, %v826_v7, -inf  ;;  %v827_v12 = vadd.f32 %v819_v2, %v607_v36 }
 0x305   : > { %846 = vmax.xlane.f32.xlu1 %v845_v11 }
 0x306   : > { %v848_v16 = vsel %vm829_vm10, %v827_v12, -inf  ;;  %v828_v18 = vadd.f32 %v820_v9, %v608_v40 }
 0x307   : > { %849 = vmax.xlane.f32.xlu0 %v848_v16 }
 0x308   : > { %v851_v19 = vsel %vm829_vm10, %v828_v18, -inf }
 0x309   : > { %852 = vmax.xlane.f32.xlu1 %v851_v19 }
 0x31a   : > { %969 = vrot.lane.b32.xlu1 %v2400_v15, %s2159_s23 }
 0x31d   : > { %922 = vrot.lane.b32.xlu0 %v2392_v13, %s2159_s23  ;;  %v832_v20 = vpop.xlane.xlu1 %831 }
 0x31e   : > { %v854_v22 = vsub.f32 %v821_v43, %v832_v20 }
 0x31f   : > { %v835_v21 = vpop.xlane.xlu0 %834 }
 0x320   : > { %v855_v23 = vsub.f32 %v822_v45, %v835_v21  ;;  %v862_v24 = vmul.f32 1.442695, %v854_v22  ;;  %v1112_v22 = vld [vmem:[#allocation2] sm:$0xf] }
 0x322   : > { %v864_v25 = vmul.f32 1.442695, %v855_v23  ;;  %1967 = vpow2.f32 %v862_v24 }
 0x324   : > { %1969 = vpow2.f32 %v864_v25 }
 0x32c   : > { %v1968_v26 = vpop.eup %1967 }
 0x32d   : > { %v878_v28 = vsel %vm829_vm10, %v1968_v26, 0.0 }
 0x32e   : > { %v1970_v27 = vpop.eup %1969 }
 0x32f   : > { %v881_v29 = vsel %vm829_vm10, %v1970_v27, 0.0 }
 0x33c   : > { %879 = vadd.xlane.f32.xlu0 %v878_v28  ;;  %v1118_v28 = vsel %vm1116_vm11, %v1112_v22, 0 }
 0x33e   : > { %882 = vadd.xlane.f32.xlu1 %v881_v29 }
 0x38c   : > { %v838_v15 = vpop.xlane.xlu0 %837 }
 0x38d   : > { %v856_v30 = vsub.f32 %v823_v53, %v838_v15  ;;  %v1171_v15 = vld [vmem:[#allocation2 + $0x4] sm:$0xf] }
 0x38e   : > { %v841_v31 = vpop.xlane.xlu1 %840 }
 0x38f   : > { %v866_v13 = vmul.f32 1.442695, %v856_v30  ;;  %v857_v32 = vsub.f32 %v824_v58, %v841_v31 }
 0x390   : > { %v844_v33 = vpop.xlane.xlu0 %843 }
 0x391   : > { %1971 = vpow2.f32 %v866_v13  ;;  %v868_v34 = vmul.f32 1.442695, %v857_v32  ;;  %v858_v35 = vsub.f32 %v825_v63, %v844_v33  ;;  %v1176_v32 = vsel %vm1116_vm11, %v1171_v15, 0 }
 0x392   : > { %v847_v36 = vpop.xlane.xlu1 %846 }
 0x393   : > { %1973 = vpow2.f32 %v868_v34  ;;  %v870_v37 = vmul.f32 1.442695, %v858_v35  ;;  %v859_v38 = vsub.f32 %v826_v7, %v847_v36  ;;  %v1223_v34 = vld [vmem:[#allocation2 + $0x8] sm:$0xf] }
 0x394   : > { %v850_v39 = vpop.xlane.xlu0 %849 }
 0x395   : > { %1975 = vpow2.f32 %v870_v37  ;;  %v872_v40 = vmul.f32 1.442695, %v859_v38  ;;  %v860_v41 = vsub.f32 %v827_v12, %v850_v39  ;;  %v1228_v39 = vsel %vm1116_vm11, %v1223_v34, 0  ;;  %v1961_v34 = vld [vmem:[#allocation5] sm:$0xff]  }
 0x396   : > { %v853_v42 = vpop.xlane.xlu1 %852 }
 0x397   : > { %1977 = vpow2.f32 %v872_v40  ;;  %v874_v43 = vmul.f32 1.442695, %v860_v41  ;;  %v861_v44 = vsub.f32 %v828_v18, %v853_v42  ;;  %v1275_v41 = vld [vmem:[#allocation2 + $0xc] sm:$0xf] }
 0x398   : > { %v923_v45 = vpop.permute.xlu0 %922 }
 0x399   : > { %1979 = vpow2.f32 %v874_v43  ;;  %v876_v46 = vmul.f32 1.442695, %v861_v44  ;;  %1819 = vmatpush3.bf16.msra.mxu1 %v923_v45 }
 0x39a   : > { %v970_v47 = vpop.permute.xlu1 %969  ;;  %1830 = vmatprep.subr.bf16.mxu1 %v2151_v0 }
 0x39b   : > { %v1972_v48 = vpop.eup %1971  ;;  %1981 = vpow2.f32 %v876_v46  ;;  %1825 = vmatpush3.bf16.msra.mxu0 %v970_v47  ;;  %v1280_v46 = vsel %vm1116_vm11, %v1275_v41, 0 }
 0x39c   : > { %v884_v49 = vsel %vm829_vm10, %v1972_v48, 0.0  ;;  %1836 = vmatprep.subr.bf16.mxu0 %v2151_v0 }
 0x39d   : > { %v1974_v50 = vpop.eup %1973  ;;  %885 = vadd.xlane.f32.xlu0 %v884_v49 }
 0x39e   : > { %v887_v51 = vsel %vm829_vm10, %v1974_v50, 0.0 }
 0x39f   : > { %v1976_v52 = vpop.eup %1975  ;;  %888 = vadd.xlane.f32.xlu1 %v887_v51 }
 0x3a0   : > { %v890_v53 = vsel %vm829_vm10, %v1976_v52, 0.0 }
 0x3a1   : > { %v1978_v54 = vpop.eup %1977  ;;  %891 = vadd.xlane.f32.xlu0 %v890_v53 }
 0x3a2   : > { %v893_v55 = vsel %vm829_vm10, %v1978_v54, 0.0 }
 0x3a3   : > { %v1980_v56 = vpop.eup %1979  ;;  %894 = vadd.xlane.f32.xlu1 %v893_v55 }
 0x3a4   : > { %v896_v57 = vsel %vm829_vm10, %v1980_v56, 0.0 }
 0x3a5   : > { %v1982_v58 = vpop.eup %1981  ;;  %897 = vadd.xlane.f32.xlu0 %v896_v57 }
 0x3a6   : > { %v899_v59 = vsel %vm829_vm10, %v1982_v58, 0.0 }
 0x3a7   : > { %900 = vadd.xlane.f32.xlu1 %v899_v59 }
 0x3b8   : > { %1016 = vrot.lane.b32.xlu1 %v2403_v17, %s2159_s23 }
 0x3bb   : > { %1063 = vrot.lane.b32.xlu0 %v2398_v14, %s2159_s23 }
 0x3c9   : > { %v880_v60 = vpop.xlane.xlu0 %879 }
 0x3ca   : > { %1983 = vrcp.f32 %v880_v60 }
 0x3cb   : > { %v883_v61 = vpop.xlane.xlu1 %882 }
 0x3cc   : > { %1985 = vrcp.f32 %v883_v61  ;;  %v1726_v61 = vld [vmem:[%s2600_s5] ss:$0 sm:$0xff] }
 0x3d4   : > { %v1984_v62 = vpop.eup %1983 }
 0x3d5   : > { %v910_v1 = vmul.f32 %v1984_v62, %v1968_v26 }
 0x3d6   : > { %v1986_v63 = vpop.eup %1985 }
 0x3d7   : > { %v911_v2 = vmul.f32 %v1986_v63, %v1970_v27 }
 0x3d9   : > { %v918_v5 = vpack.c.bf16 %v911_v2, %v910_v1 }
 0x3db   : > { %1821 = vmatmul.mubr.msk.bf16.vlgmr.msra.gmra.mrb[12].mxu1 %vm829_vm10, %v918_v5 }
 0x3dc   : > { %1832 = vmatprep.mubr.msk.bf16.mxu1 %vm2152_vm0, %v2151_v0 }
 0x42a   : > { %v886_v6 = vpop.xlane.xlu0 %885 }
 0x42b   : > { %1987 = vrcp.f32 %v886_v6 }
 0x42c   : > { %v889_v17 = vpop.xlane.xlu1 %888 }
 0x42d   : > { %1989 = vrcp.f32 %v889_v17 }
 0x42e   : > { %v892_v7 = vpop.xlane.xlu0 %891 }
 0x42f   : > { %1991 = vrcp.f32 %v892_v7 }
 0x430   : > { %v895_v14 = vpop.xlane.xlu1 %894 }
 0x431   : > { %1993 = vrcp.f32 %v895_v14 }
 0x432   : > { %v898_v8 = vpop.xlane.xlu0 %897 }
 0x433   : > { %1995 = vrcp.f32 %v898_v8 }
 0x434   : > { %v901_v9 = vpop.xlane.xlu1 %900 }
 0x435   : > { %v1988_v10 = vpop.eup %1987  ;;  %1997 = vrcp.f32 %v901_v9 }
 0x436   : > { %v912_v12 = vmul.f32 %v1988_v10, %v1972_v48  ;;  %v1064_v25 = vpop.permute.xlu0 %1063 }
 0x437   : > { %v1990_v11 = vpop.eup %1989 }
 0x438   : > { %v913_v16 = vmul.f32 %v1990_v11, %v1974_v50  ;;  %v1017_v18 = vpop.permute.xlu1 %1016 }
 0x439   : > { %v1992_v19 = vpop.eup %1991  ;;  %1831 = vmatpush3.bf16.msra.mxu1 %v1017_v18 }
 0x43a   : > { %v919_v20 = vpack.c.bf16 %v913_v16, %v912_v12  ;;  %1842 = vmatprep.subr.bf16.mxu1 %v2151_v0  ;;  %v914_v23 = vmul.f32 %v1992_v19, %v1976_v52 }
 0x43b   : > { %v1994_v21 = vpop.eup %1993 }
 0x43c   : > { %v915_v24 = vmul.f32 %v1994_v21, %v1978_v54  ;;  %1827 = vmatmul.mubr.msk.bf16.vlgmr.msra.gmra.mrb[8].mxu0 %vm829_vm10, %v919_v20 }
 0x43d   : > { %v1996_v26 = vpop.eup %1995  ;;  %1837 = vmatpush3.bf16.msra.mxu0 %v1064_v25  ;;  %1838 = vmatprep.mubr.msk.bf16.mxu0 %vm2152_vm0, %v2151_v0 }
 0x43e   : > { %v920_v27 = vpack.c.bf16 %v915_v24, %v914_v23  ;;  %1848 = vmatprep.subr.bf16.mxu0 %v2151_v0  ;;  %v916_v30 = vmul.f32 %v1996_v26, %v1980_v56 }
 0x43f   : > { %v1998_v29 = vpop.eup %1997 }
 0x440   : > { %v917_v31 = vmul.f32 %v1998_v29, %v1982_v58  ;;  %1833 = vmatmul.mubr.msk.bf16.vlgmr.msra.gmra.mrb[16].mxu1 %vm829_vm10, %v920_v27 }
 0x441   : > { %1843 = vmatpush3.bf16.msra.mxu1 %v1118_v28  ;;  %1844 = vmatprep.mubr.msk.bf16.mxu1 %vm2152_vm0, %v2151_v0 }
 0x442   : > { %v921_v13 = vpack.c.bf16 %v917_v31, %v916_v30  ;;  %1854 = vmatprep.subr.bf16.mxu1 %v2151_v0 }
 0x444   : > { %1839 = vmatmul.mubr.msk.bf16.vlgmr.msra.gmra.mrb[12].mxu0 %vm829_vm10, %v921_v13 }
 0x445   : > { %1849 = vmatpush3.bf16.msra.mxu0 %v1176_v32  ;;  %1850 = vmatprep.mubr.msk.bf16.mxu0 %vm2152_vm0, %v2151_v0 }
 0x446   : > { %1860 = vmatprep.subr.bf16.mxu0 %v2151_v0 }
 0x4ae   : > { %v962_v33 = vpop.f32.mrb[12].mxu1 }
 0x4af   : > { %v1822_v35 = vpop.f32.mrb[13].mxu1 }
 0x4b0   : > { %v965_v36 = vpop.f32.mrb[14].mxu1 }
 0x4b1   : > { %v1111_v37 = vpack.c.bf16 %v965_v36, %v962_v33  ;;  %v1823_v38 = vpop.f32.mrb[15].mxu1 }
 0x4b3   : > { %1845 = vmatmul.mubr.msk.bf16.vlgmr.msra.gmra.mrb[20].mxu1 %vm618_vm2, %v1111_v37 }
 0x4b4   : > { %1855 = vmatpush3.bf16.msra.mxu1 %v1228_v39  ;;  %1856 = vmatprep.mubr.msk.bf16.mxu1 %vm2152_vm0, %v2151_v0 }
 0x4b5   : > { %1866 = vmatprep.subr.bf16.mxu1 %v2151_v0 }
 0x50f   : > { %v1009_v40 = vpop.f32.mrb[8].mxu0 }
 0x510   : > { %v1828_v42 = vpop.f32.mrb[9].mxu0 }
 0x511   : > { %v1012_v43 = vpop.f32.mrb[10].mxu0  ;;  %v1730_v42 = vld [vmem:[%s2601_s6] ss:$0 sm:$0xff] }
 0x512   : > { %v1169_v44 = vpack.c.bf16 %v1012_v43, %v1009_v40  ;;  %v1829_v45 = vpop.f32.mrb[11].mxu0 }
 0x513   : > { %v1056_v47 = vpop.f32.mrb[16].mxu1 }
 0x514   : > { %v1834_v48 = vpop.f32.mrb[17].mxu1  ;;  %1851 = vmatmul.mubr.msk.bf16.vlgmr.msra.gmra.mrb[16].mxu0 %vm618_vm2, %v1169_v44 }
 0x515   : > { %v1059_v49 = vpop.f32.mrb[18].mxu1  ;;  %1861 = vmatpush3.bf16.msra.mxu0 %v1280_v46  ;;  %1862 = vmatprep.mubr.msk.bf16.mxu0 %vm2152_vm0, %v2151_v0 }
 0x516   : > { %v1221_v50 = vpack.c.bf16 %v1059_v49, %v1056_v47  ;;  %v1835_v51 = vpop.f32.mrb[19].mxu1  ;;  %1874 = vmatprep.subr.bf16.mxu0 %v2151_v0  ;;  %v1731_v47 = vld [vmem:[%s2602_s7] ss:$0 sm:$0xff] }
 0x517   : > { %v1103_v52 = vpop.f32.mrb[12].mxu0 }
 0x518   : > { %v1840_v53 = vpop.f32.mrb[13].mxu0  ;;  %1857 = vmatmul.mubr.msk.bf16.vlgmr.msra.gmra.mrb[24].mxu1 %vm618_vm2, %v1221_v50 }
 0x519   : > { %v1106_v54 = vpop.f32.mrb[14].mxu0  ;;  %1870 = vmatprep.mubr.msk.bf16.mxu1 %vm2152_vm0, %v2151_v0  ;;  %1867 = vmatpush3.bf16.msra.mxu1 %v1961_v34  ;;  %v1964_v53 = vld [vmem:[%s2605_s10 + $0x8] sm:$0xff]  }
 0x51a   : > { %v1273_v55 = vpack.c.bf16 %v1106_v54, %v1103_v52  ;;  %v1841_v56 = vpop.f32.mrb[15].mxu0  ;;  %1868 = vmatprep.subr.bf16.mxu1 %v2151_v0  ;;  %v1963_v52 = vld [vmem:[%s2605_s10] sm:$0xff]   ;;  %v1965_v54 = vld [vmem:[%s2605_s10 + $0x10] sm:$0xff]  }
 0x51b   : > { %v1732_v56 = vld [vmem:[%s2604_s9] ss:$0 sm:$0xff] }
 0x51c   : > { %1863 = vmatmul.mubr.msk.bf16.vlgmr.msra.gmra.mrb[20].mxu0 %vm618_vm2, %v1273_v55  ;;  %v1966_v55 = vld [vmem:[%s2605_s10 + $0x18] sm:$0xff]  }
 0x51d   : > { %1882 = vmatprep.mubr.msk.bf16.mxu0 %vm2152_vm0, %v2151_v0  ;;  %1875 = vmatpush3.bf16.msra.mxu0 %v1963_v52 }
 0x51e   : > { %1876 = vmatprep.subr.bf16.mxu0 %v2151_v0 }
 0x521   : > { %1877 = vmatpush3.bf16.msra.mxu0 %v1964_v53  ;;  %v1743_v53 = vld [vmem:[%s2608_s13] ss:$0 sm:$0xff] }
 0x522   : > { %1878 = vmatprep.subr.bf16.mxu0 %v2151_v0 }
 0x525   : > { %1879 = vmatpush3.bf16.msra.mxu0 %v1965_v54 }
 0x526   : > { %1880 = vmatprep.subr.bf16.mxu0 %v2151_v0 }
 0x529   : > { %1881 = vmatpush3.bf16.msra.mxu0 %v1966_v55 }
 0x586   : > { %v1154_v57 = vpop.f32.mrb[20].mxu1 }
 0x587   : > { %v1846_v58 = vpop.f32.mrb[21].mxu1  ;;  %v1167_v62 = vadd.f32 %v1726_v61, %v1154_v57 }
 0x588   : > { %v1157_v59 = vpop.f32.mrb[22].mxu1 }
 0x589   : > { %v1847_v60 = vpop.f32.mrb[23].mxu1  ;;  %v1168_v1 = vadd.f32 %v1726_v61, %v1157_v59 }
 0x5e7   : > { %v1212_v63 = vpop.f32.mrb[16].mxu0 }
 0x5e8   : > { %v1219_v2 = vadd.f32 %v1212_v63, %v1167_v62  ;;  %v1852_v5 = vpop.f32.mrb[17].mxu0 }
 0x5e9   : > { %v1215_v6 = vpop.f32.mrb[18].mxu0 }
 0x5ea   : > { %v1220_v17 = vadd.f32 %v1215_v6, %v1168_v1  ;;  %v1853_v7 = vpop.f32.mrb[19].mxu0 }
 0x5eb   : > { %v1264_v14 = vpop.f32.mrb[24].mxu1 }
 0x5ec   : > { %v1271_v8 = vadd.f32 %v1264_v14, %v1219_v2  ;;  %v1858_v9 = vpop.f32.mrb[25].mxu1 }
 0x5ed   : > { %v1267_v10 = vpop.f32.mrb[26].mxu1 }
 0x5ee   : > { %v1272_v11 = vadd.f32 %v1267_v10, %v1220_v17  ;;  %v1859_v12 = vpop.f32.mrb[27].mxu1 }
 0x5ef   : > { %v1316_v16 = vpop.f32.mrb[20].mxu0 }
 0x5f0   : > { %v1323_v18 = vadd.f32 %v1316_v16, %v1271_v8  ;;  %v1864_v19 = vpop.f32.mrb[21].mxu0 }
 0x5f1   : > { %v1319_v20 = vpop.f32.mrb[22].mxu0 }
 0x5f2   : > { %v1324_v21 = vadd.f32 %v1319_v20, %v1272_v11  ;;  %v1865_v22 = vpop.f32.mrb[23].mxu0  ;;  %v1325_v23 = vadd.f32 %v1323_v18, %v2378_v3 }
 0x5f4   : > { %v1329_v24 = vsel %vm537_vm1, %v1325_v23, 0.0  ;;  %v1326_v25 = vadd.f32 %v1324_v21, %v2380_v4  ;;  %v1962_v4 = vld [vmem:[#allocation5 + $0x8] sm:$0xff]  }
 0x5f5   : > { %1330 = vadd.xlane.f32.xlu1 %v1329_v24  ;;  %1869 = vmatpush3.bf16.msra.mxu1 %v1962_v4 }
 0x5f6   : > { %v1332_v26 = vsel %vm537_vm1, %v1326_v25, 0.0 }
 0x5f7   : > { %1333 = vadd.xlane.f32.xlu0 %v1332_v26  ;;  %v1736_v26 = vld [vmem:[%s2606_s11] ss:$0 sm:$0xff] }
 0x682   : > { %v1331_v27 = vpop.xlane.xlu1 %1330 }
 0x683   : > { %v1336_v28 = vmul.f32 0.03125, %v1331_v27 }
 0x684   : > { %v1334_v29 = vpop.xlane.xlu0 %1333 }
 0x685   : > { %v1338_v15 = vsub.f32 %v1325_v23, %v1336_v28  ;;  %v1337_v30 = vmul.f32 0.03125, %v1334_v29 }
 0x687   : > { %v1339_v31 = vsub.f32 %v1326_v25, %v1337_v30  ;;  %v1340_v13 = vmul.f32 %v1338_v15, %v1338_v15 }
 0x689   : > { %v1342_v32 = vsel %vm537_vm1, %v1340_v13, 0.0  ;;  %v1341_v33 = vmul.f32 %v1339_v31, %v1339_v31 }
 0x68a   : > { %1343 = vadd.xlane.f32.xlu0 %v1342_v32 }
 0x68b   : > { %v1345_v3 = vsel %vm537_vm1, %v1341_v33, 0.0 }
 0x68c   : > { %1346 = vadd.xlane.f32.xlu1 %v1345_v3 }
 0x717   : > { %v1344_v35 = vpop.xlane.xlu0 %1343 }
 0x718   : > { %v1348_v36 = vmul.f32 0.03125, %v1344_v35 }
 0x719   : > { %v1347_v37 = vpop.xlane.xlu1 %1346 }
 0x71a   : > { %v1350_v38 = vadd.f32 1e-12, %v1348_v36  ;;  %v1349_v39 = vmul.f32 0.03125, %v1347_v37 }
 0x71c   : > { %1999 = vrsqrt.f32 %v1350_v38  ;;  %v1351_v40 = vadd.f32 1e-12, %v1349_v39 }
 0x71e   : > { %2001 = vrsqrt.f32 %v1351_v40 }
 0x726   : > { %v2000_v41 = vpop.eup %1999 }
 0x727   : > { %v1354_v43 = vmul.f32 %v2000_v41, %v1338_v15 }
 0x728   : > { %v2002_v44 = vpop.eup %2001 }
 0x729   : > { %v1362_v45 = vmul.f32 %v1730_v42, %v1354_v43  ;;  %v1355_v46 = vmul.f32 %v2002_v44, %v1339_v31 }
 0x72b   : > { %v1363_v48 = vmul.f32 %v1730_v42, %v1355_v46  ;;  %v1370_v49 = vadd.f32 %v1731_v47, %v1362_v45 }
 0x72d   : > { %v1371_v50 = vadd.f32 %v1731_v47, %v1363_v48 }
 0x72f   : > { %v1372_v51 = vpack.c.bf16 %v1371_v50, %v1370_v49 }
 0x731   : > { %1871 = vmatmul.mubr.msk.bf16.vlgmr.msra.gmra.mrb[28].mxu1 %vm537_vm1, %v1372_v51 }
 0x804   : > { %v1433_v57 = vpop.f32.mrb[28].mxu1 }
 0x805   : > { %v1434_v58 = vadd.f32 %v1732_v56, %v1433_v57  ;;  %v1872_v59 = vpop.f32.mrb[29].mxu1 }
 0x806   : > { %v1436_v60 = vpop.f32.mrb[30].mxu1 }
 0x807   : > { %v1442_v61 = vand.u32 2147483647, %v1434_v58  ;;  %v1437_v62 = vadd.f32 %v1732_v56, %v1436_v60  ;;  %v1873_v63 = vpop.f32.mrb[31].mxu1  ;;  %v1440_v10 = vmax.f32 %v1434_v58, 0.0 }
 0x809   : > { %v1444_v1 = vsub.f32 0.0, %v1442_v61  ;;  %v1443_v2 = vand.u32 2147483647, %v1437_v62  ;;  %v1441_v18 = vmax.f32 %v1437_v62, 0.0 }
 0x80b   : > { %v1446_v5 = vmul.f32 1.442695, %v1444_v1  ;;  %v1445_v0 = vsub.f32 0.0, %v1443_v2 }
 0x80d   : > { %2003 = vpow2.f32 %v1446_v5  ;;  %v1448_v6 = vmul.f32 1.442695, %v1445_v0 }
 0x80f   : > { %2005 = vpow2.f32 %v1448_v6 }
 0x817   : > { %v2004_v17 = vpop.eup %2003 }
 0x818   : > { %v1450_v7 = vadd.f32 1.0, %v2004_v17 }
 0x819   : > { %v2006_v14 = vpop.eup %2005 }
 0x81a   : > { %2007 = vlog2.f32 %v1450_v7  ;;  %v1451_v8 = vadd.f32 1.0, %v2006_v14 }
 0x81c   : > { %2009 = vlog2.f32 %v1451_v8 }
 0x824   : > { %v2008_v9 = vpop.eup %2007 }
 0x825   : > { %v1453_v11 = vmul.f32 0.6931472, %v2008_v9 }
 0x826   : > { %v2010_v12 = vpop.eup %2009 }
 0x827   : > { %v1456_v16 = vadd.f32 %v1453_v11, %v1440_v10  ;;  %v1455_v19 = vmul.f32 0.6931472, %v2010_v12 }
 0x829   : > { %2011 = vtanh.f32 %v1456_v16  ;;  %v1457_v20 = vadd.f32 %v1455_v19, %v1441_v18 }
 0x82b   : > { %2013 = vtanh.f32 %v1457_v20 }
 0x833   : > { %v2012_v21 = vpop.eup %2011 }
 0x834   : > { %v1460_v23 = vmul.f32 %v2012_v21, %v1434_v58 }
 0x835   : > { %v2014_v22 = vpop.eup %2013 }
 0x836   : > { %v1461_v24 = vmul.f32 %v2014_v22, %v1437_v62 }
 0x838   : > { %v1462_v25 = vpack.c.bf16 %v1461_v24, %v1460_v23 }
 0x83a   : > { %1883 = vmatmul.mubr.msk.bf16.vlgmr.msra.gmra.mrb[24].mxu0 %vm1502_vm12, %v1462_v25 }
 0x90d   : > { %v1540_v27 = vpop.f32.mrb[24].mxu0 }
 0x90e   : > { %v1541_v28 = vadd.f32 %v1736_v26, %v1540_v27  ;;  %v1884_v29 = vpop.f32.mrb[25].mxu0 }
 0x90f   : > { %v1543_v15 = vpop.f32.mrb[26].mxu0 }
 0x910   : > { %v1544_v30 = vadd.f32 %v1736_v26, %v1543_v15  ;;  %v1885_v31 = vpop.f32.mrb[27].mxu0  ;;  %v1547_v13 = vadd.f32 %v1541_v28, %v1370_v49 }
 0x912   : > { %v1551_v32 = vsel %vm537_vm1, %v1547_v13, 0.0  ;;  %v1548_v33 = vadd.f32 %v1544_v30, %v1371_v50  ;;  %v1742_v50 = vld [vmem:[%s2607_s12] ss:$0 sm:$0xff] }
 0x913   : > { %1552 = vadd.xlane.f32.xlu0 %v1551_v32 }
 0x914   : > { %v1554_v3 = vsel %vm537_vm1, %v1548_v33, 0.0 }
 0x915   : > { %1555 = vadd.xlane.f32.xlu1 %v1554_v3 }
 0x9a0   : > { %v1553_v34 = vpop.xlane.xlu0 %1552 }
 0x9a1   : > { %v1557_v4 = vmul.f32 0.03125, %v1553_v34 }
 0x9a2   : > { %v1556_v35 = vpop.xlane.xlu1 %1555 }
 0x9a3   : > { %v1559_v36 = vsub.f32 %v1547_v13, %v1557_v4  ;;  %v1558_v37 = vmul.f32 0.03125, %v1556_v35 }
 0x9a5   : > { %v1560_v38 = vsub.f32 %v1548_v33, %v1558_v37  ;;  %v1561_v39 = vmul.f32 %v1559_v36, %v1559_v36 }
 0x9a7   : > { %v1563_v40 = vsel %vm537_vm1, %v1561_v39, 0.0  ;;  %v1562_v41 = vmul.f32 %v1560_v38, %v1560_v38 }
 0x9a8   : > { %1564 = vadd.xlane.f32.xlu0 %v1563_v40 }
 0x9a9   : > { %v1566_v42 = vsel %vm537_vm1, %v1562_v41, 0.0 }
 0x9aa   : > { %1567 = vadd.xlane.f32.xlu1 %v1566_v42 }
 0xa35   : > { %v1565_v43 = vpop.xlane.xlu0 %1564 }
 0xa36   : > { %v1569_v44 = vmul.f32 0.03125, %v1565_v43 }
 0xa37   : > { %v1568_v45 = vpop.xlane.xlu1 %1567 }
 0xa38   : > { %v1571_v46 = vadd.f32 1e-12, %v1569_v44  ;;  %v1570_v47 = vmul.f32 0.03125, %v1568_v45 }
 0xa3a   : > { %2015 = vrsqrt.f32 %v1571_v46  ;;  %v1572_v48 = vadd.f32 1e-12, %v1570_v47 }
 0xa3c   : > { %2017 = vrsqrt.f32 %v1572_v48 }
 0xa44   : > { %v2016_v49 = vpop.eup %2015 }
 0xa45   : > { %v1575_v51 = vmul.f32 %v2016_v49, %v1559_v36 }
 0xa46   : > { %v2018_v52 = vpop.eup %2017 }
 0xa47   : > { %v1583_v54 = vmul.f32 %v1742_v50, %v1575_v51  ;;  %v1576_v55 = vmul.f32 %v2018_v52, %v1560_v38 }
 0xa49   : > { %v1591_v56 = vadd.f32 %v1743_v53, %v1583_v54  ;;  %v1584_v57 = vmul.f32 %v1742_v50, %v1576_v55 }
 0xa4b   : > { %v1592_v58 = vadd.f32 %v1743_v53, %v1584_v57  ;;  %1593 = vst.msk [vmem:[%s501_s25] sm:$0xff] %vm537_vm1, %v1591_v56 }
 0xa4d   : > { %1594 = vst.msk [vmem:[%s501_s25 + $0x8] sm:$0xff] %vm537_vm1, %v1592_v58 }
 0xa4e   : > { %2088 = shalt.err (!%p2085_p11)
}
 0xa4f   : > { %s2089_s15 = scalar_lea.hbm %s2548_s22, 256  ;;  %s2093_s16 = scalar_lea.hbm %s2640_s19, 512 }
 0xa50   : > { %p2090_p13 = scmp.ne.s32.totalorder %s2548_s22, %s2089_s15  ;;  %p2094_p6 = scmp.lt.u32.totalorder %s2548_s22, %s2640_s19 }
 0xa51   : > { %p2095_p9 = scmp.lt.u32.totalorder %s2093_s16, %s2089_s15  ;;  %p2097_p12 = scmp.lt.u32.totalorder %s2089_s15, %s2548_s22 }
 0xa52   : > { %p2091_p5 = pnand %p2090_p13, %p2641_p1 }
 0xa53   : > { %p2096_p10 = por %p2095_p9, %p2094_p6 }
 0xa54   : > { %p2092_p0 = pneg %p2091_p5 }
 0xa55   : > { %p2098_p2 = por %p2097_p12, %p2096_p10 }
 0xa57   : > { %p2099_p3 = pnand %p2098_p2, %p2092_p0 }
 0xa59   : > { %2102 = shalt.err (!%p2099_p3)
}
 0xa5a   : > { %s2161_s23 = smov 128   ;;  %s2162_s29 = smov 8  }
 0xa5b   : > { %1894 = dma.vmem_to_hbm [thread:$0]  (%p2641_p1), %s2550_s28, 256, %s2548_s22, %s2554_s17, %s2161_s23, %s2161_s23, %s2162_s29  }
 0xa5c PF: > { %s2642_s24 = sld [smem:[#allocation13_spill]]  ;;  %s2643_s21 = sld [smem:[#allocation11_spill]] }
 0xa5d   : > { %s2644_s26 = sld [smem:[#allocation17_spill]] }
 0xa62   : > { %p1911_p4 = scmp.ge.s32.totalorder %s2642_s24, 2  ;;  %s1624_s18 = sand.u32 1, %s2643_s21  }
 0xa63   : > { %p2645_p7 = scmp.ne.s32.totalorder %s2644_s26, 0  ;;  %s1625_s15 = scalar_lea.sflag [#allocation4], %s1624_s18 }
 0xa65   : > { %p1904_p8 = pnand %p1911_p4, %p2645_p7 }
 0xa67   : > { %2128 = dma.done.wait (!%p1904_p8), %s1625_s15, 256  }
 0xa68   : > { %2130 = vsyncadd (!%p1904_p8), %s1625_s15, 4294967040  ;;  %s2646_s16 = sld [smem:[#allocation14_spill]]  ;;  %s2647_s27 = sld [smem:[#allocation12_spill]] }
 0xa69   : > { %s2648_s15 = sld [smem:[#allocation15_spill]]  ;;  %s2649_s29 = smov %s2137_s30 }
 0xa6e   : > { %p26_p11 = scmp.ge.s32.totalorder %s2646_s16, 4   ;;  %s2650_s30 = smov %s2647_s27 }
 0xa70   :  { %28 = sbr.rel (!%p26_p11) target bundleno = 7 (0x7), region = 126 }
 0xa77   :  { %1630 = vsyncpa [#allocation3], 1 }
 0xa78   :  { %1632 = vsyncpa [#allocation3 + $0x1], 1 }
 0xa79   :  { %1633 = vsyncpa [#allocation6], 1 }
 0xa7a   :  { %1634 = vsyncpa [#allocation4], 1 }
 0xa7b   :  { %1636 = vsyncpa [#allocation4 + $0x1], 1 }

</bundles_post_ra>
